<compile_context>
chip_gen: v5e
topology: v5e:2x2
jax: 0.10.0
libtpu: 0.0.40
codegen_flags: <defaults>
</compile_context>

<pallas_src>
import functools

import jax
import jax.numpy as jnp
from jax.experimental import pallas as pl
from jax.experimental.pallas import tpu as pltpu


_VMEM_LIMIT = 48 * 1024 * 1024  # fits v7x (64 MiB physical) and v5e/v6e (128 MiB)


# ----------------------------------------------------------------------------
# tile-size helpers
# ----------------------------------------------------------------------------
def _pick_row_tile(m, cap=512):
    """Row tile for token axis M (multiple of 8; edge blocks are masked)."""
    if m <= cap:
        return m
    return max(8, (cap // 8) * 8)


def _pick_col_tile(n, cap=2048):
    """Column / contraction tile: exactly divides n and is a multiple of 128."""
    if n <= cap:
        return n
    best = 0
    t = 128
    while t <= cap:
        if n % t == 0:
            best = t
        t += 128
    return best if best else n


def _pick_seq_tile(n, cap):
    """Sequence tile that exactly divides n (needed for exact softmax over KV)."""
    if n <= cap:
        return n
    best = 0
    t = 8
    while t <= cap:
        if n % t == 0:
            best = t
        t += 8
    # TODO(synk): pad ragged sequence lengths (e.g. N=197) instead of whole-seq fallback.
    return best if best else n


def _pick_head_block(num_heads, dtype):
    """Heads per attention grid step: a sublane multiple of the dtype, or all heads."""
    sub = {4: 8, 2: 16, 1: 32}.get(jnp.dtype(dtype).itemsize, 8)
    return sub if (num_heads % sub == 0) else num_heads


# ----------------------------------------------------------------------------
# kernel 1: fused LayerNorm + matmul + bias (+ optional GELU), N-axis tiled
# ----------------------------------------------------------------------------
def _ln_matmul_kernel(x_ref, g_ref, b_ref, w_ref, wb_ref, o_ref, xn_ref, *,
                      eps, activation):
    j = pl.program_id(1)

    @pl.when(j == 0)
    def _():
        # LayerNorm statistics in f32; normalized activations cached in the MXU
        # input dtype so bf16 inputs/weights hit the native bf16 MXU path.
        x = x_ref[...].astype(jnp.float32)
        mean = jnp.mean(x, axis=-1, keepdims=True)
        xc = x - mean
        var = jnp.mean(xc * xc, axis=-1, keepdims=True)
        xn = xc * jax.lax.rsqrt(var + eps)
        xn = xn * g_ref[...].astype(jnp.float32) + b_ref[...].astype(jnp.float32)
        xn_ref[...] = xn.astype(xn_ref.dtype)

    acc = jnp.dot(xn_ref[...], w_ref[...], preferred_element_type=jnp.float32)
    acc = acc + wb_ref[...].astype(jnp.float32)
    if activation == "gelu":
        # TODO(synk): PyTorch nn.GELU defaults to erf-exact; tanh approximation is used
        # here (and in the in-file reference) for guaranteed Mosaic lowering.
        acc = jax.nn.gelu(acc, approximate=True)
    o_ref[...] = acc.astype(o_ref.dtype)


def ln_matmul(x, gamma, beta, w, b, *, activation=None, eps=1e-6,
              tm_cap=512, tn_cap=2048):
    """out = LayerNorm(x) @ w + b (optional GELU). x:(M,K) w:(K,N)."""
    M, K = x.shape
    _, N = w.shape
    tm = _pick_row_tile(M, tm_cap)
    tn = _pick_col_tile(N, tn_cap)
    grid = (pl.cdiv(M, tm), pl.cdiv(N, tn))
    bpe_x = jnp.dtype(x.dtype).itemsize
    bpe_w = jnp.dtype(w.dtype).itemsize
    w_reads = K * N if grid[1] == 1 else grid[0] * K * N
    cost = pl.CostEstimate(
        flops=2 * M * K * N + 10 * M * K,
        transcendentals=(M * N if activation == "gelu" else 0) + M,
        bytes_accessed=bpe_x * (M * K + M * N) + bpe_w * w_reads + 4 * (2 * K + N),
    )
    return pl.pallas_call(
        functools.partial(_ln_matmul_kernel, eps=eps, activation=activation),
        out_shape=jax.ShapeDtypeStruct((M, N), x.dtype),
        grid_spec=pltpu.PrefetchScalarGridSpec(
            num_scalar_prefetch=0,
            grid=grid,
            in_specs=[
                pl.BlockSpec((tm, K), lambda i, j: (i, 0)),   # x tile (resident over j)
                pl.BlockSpec((1, K), lambda i, j: (0, 0)),    # gamma (resident)
                pl.BlockSpec((1, K), lambda i, j: (0, 0)),    # beta  (resident)
                pl.BlockSpec((K, tn), lambda i, j: (0, j)),   # weight column tile
                pl.BlockSpec((1, tn), lambda i, j: (0, j)),   # bias column tile
            ],
            out_specs=pl.BlockSpec((tm, tn), lambda i, j: (i, j)),
            scratch_shapes=[pltpu.VMEM((tm, K), w.dtype)],    # normalized-x cache
        ),
        compiler_params=pltpu.CompilerParams(
            dimension_semantics=("parallel", "arbitrary"),
            vmem_limit_bytes=_VMEM_LIMIT),
        cost_estimate=cost,
    )(x, gamma.reshape(1, K), beta.reshape(1, K), w, b.reshape(1, N))


# ----------------------------------------------------------------------------
# kernel 2: flash attention over the native qkv layout (no XLA transposes)
# ----------------------------------------------------------------------------
def _flash_attn_kernel(q_ref, k_ref, v_ref, o_ref, m_sc, l_sc, acc_sc, *, scale):
    ki = pl.program_id(3)

    @pl.when(ki == 0)
    def _():
        m_sc[...] = jnp.full(m_sc.shape, -jnp.inf, m_sc.dtype)
        l_sc[...] = jnp.zeros(l_sc.shape, l_sc.dtype)
        acc_sc[...] = jnp.zeros(acc_sc.shape, acc_sc.dtype)

    # Blocks are (1, t, 1, hblk, dh); bring heads to the leading (batch) axis so the
    # score / PV contractions are plain leading-batch matmuls on the MXU.
    q = pltpu.einshape("qhd->hqd", q_ref[0, :, 0, :, :])      # (hblk, tq, dh)
    k = pltpu.einshape("khd->hkd", k_ref[0, :, 0, :, :])      # (hblk, tk, dh)
    v = pltpu.einshape("khd->hkd", v_ref[0, :, 0, :, :])      # (hblk, tk, dh)

    s = jnp.einsum("hqd,hkd->hqk", q, k,
                   preferred_element_type=jnp.float32) * scale  # f32 scores
    m_prev = m_sc[...]
    m_new = jnp.maximum(m_prev, jnp.max(s, axis=-1, keepdims=True))
    alpha = jnp.exp(m_prev - m_new)
    p = jnp.exp(s - m_new)
    l_sc[...] = alpha * l_sc[...] + jnp.sum(p, axis=-1, keepdims=True)
    acc_sc[...] = alpha * acc_sc[...] + jnp.einsum(
        "hqk,hkd->hqd", p.astype(v.dtype), v, preferred_element_type=jnp.float32)
    m_sc[...] = m_new

    @pl.when(ki == pl.num_programs(3) - 1)
    def _():
        out = acc_sc[...] * pl.reciprocal(l_sc[...], approx=True)   # (hblk, tq, dh)
        o_ref[0, :, :, :] = pltpu.einshape("hqd->qhd", out).astype(o_ref.dtype)


def flash_attention(qkv, *, scale, tq_cap=256, tk_cap=256):
    """qkv: (B, N, 3, H, dh) -> attention output (B, N, H, dh) (head-interleaved)."""
    B, N, _, H, dh = qkv.shape
    hblk = _pick_head_block(H, qkv.dtype)
    tq = _pick_seq_tile(N, tq_cap)
    tk = _pick_seq_tile(N, tk_cap)
    n_q = N // tq
    bpe = jnp.dtype(qkv.dtype).itemsize
    cost = pl.CostEstimate(
        flops=4 * B * H * N * N * dh,
        transcendentals=B * H * N * N,
        # q read once + output written once + K/V re-read once per q tile.
        bytes_accessed=bpe * (2 * B * N * H * dh + 2 * B * N * H * dh * n_q),
    )
    return pl.pallas_call(
        functools.partial(_flash_attn_kernel, scale=scale),
        out_shape=jax.ShapeDtypeStruct((B, N, H, dh), qkv.dtype),
        grid_spec=pltpu.PrefetchScalarGridSpec(
            num_scalar_prefetch=0,
            grid=(B, H // hblk, N // tq, N // tk),
            in_specs=[
                pl.BlockSpec((1, tq, 1, hblk, dh),
                             lambda b, h, qi, ki: (b, qi, 0, h, 0)),   # q slice
                pl.BlockSpec((1, tk, 1, hblk, dh),
                             lambda b, h, qi, ki: (b, ki, 1, h, 0)),   # k slice
                pl.BlockSpec((1, tk, 1, hblk, dh),
                             lambda b, h, qi, ki: (b, ki, 2, h, 0)),   # v slice
            ],
            out_specs=pl.BlockSpec((1, tq, hblk, dh),
                                   lambda b, h, qi, ki: (b, qi, h, 0)),
            scratch_shapes=[
                pltpu.VMEM((hblk, tq, 1), jnp.float32),   # running max
                pltpu.VMEM((hblk, tq, 1), jnp.float32),   # running sum
                pltpu.VMEM((hblk, tq, dh), jnp.float32),  # output accumulator
            ],
        ),
        compiler_params=pltpu.CompilerParams(
            dimension_semantics=("parallel", "parallel", "parallel", "arbitrary"),
            vmem_limit_bytes=_VMEM_LIMIT),
        cost_estimate=cost,
    )(qkv, qkv, qkv)


# ----------------------------------------------------------------------------
# kernel 3: fused attn.proj + bias + residual + norm2 + mlp.fc1 + GELU
# ----------------------------------------------------------------------------
def _proj_res_ln_fc1_kernel(a_ref, wp_ref, bp_ref, r_ref, g_ref, b2_ref,
                            w1_ref, b1_ref, x2_ref, h_ref, *, eps):
    # attention output projection + residual (f32 accumulation)
    x2 = jnp.dot(a_ref[...], wp_ref[...], preferred_element_type=jnp.float32)
    x2 = x2 + bp_ref[...].astype(jnp.float32) + r_ref[...].astype(jnp.float32)
    x2_ref[...] = x2.astype(x2_ref.dtype)

    # norm2 (f32 stats) + mlp.fc1 + GELU on the tile already resident in VMEM
    mean = jnp.mean(x2, axis=-1, keepdims=True)
    xc = x2 - mean
    var = jnp.mean(xc * xc, axis=-1, keepdims=True)
    xn = xc * jax.lax.rsqrt(var + eps)
    xn = xn * g_ref[...].astype(jnp.float32) + b2_ref[...].astype(jnp.float32)
    h = jnp.dot(xn.astype(w1_ref.dtype), w1_ref[...], preferred_element_type=jnp.float32)
    h = jax.nn.gelu(h + b1_ref[...].astype(jnp.float32), approximate=True)
    h_ref[...] = h.astype(h_ref.dtype)


def attn_proj_mlp_fc1(a, wp, bp, residual, gamma, beta, w1, b1, *, eps=1e-6,
                      tm_cap=512):
    """x2 = residual + a@wp + bp ; h = GELU(LN(x2)@w1 + b1). Returns (x2, h)."""
    # TODO(synk): for very large C/hidden on v7x fall back to the unfused path
    # (block_forward(fuse_proj_mlp=False)) so fc1 weights can be N-tiled.
    M, C = a.shape
    _, Nh = w1.shape
    tm = _pick_row_tile(M, tm_cap)
    bpe_a = jnp.dtype(a.dtype).itemsize
    bpe_w = jnp.dtype(wp.dtype).itemsize
    cost = pl.CostEstimate(
        flops=2 * M * C * C + 2 * M * C * Nh + 14 * M * C,
        transcendentals=M * Nh + M,
        bytes_accessed=bpe_a * (3 * M * C + M * Nh) + bpe_w * (C * C + C * Nh) + 8 * C + 4 * Nh,
    )
    return pl.pallas_call(
        functools.partial(_proj_res_ln_fc1_kernel, eps=eps),
        out_shape=(jax.ShapeDtypeStruct((M, C), a.dtype),
                   jax.ShapeDtypeStruct((M, Nh), a.dtype)),
        grid_spec=pltpu.PrefetchScalarGridSpec(
            num_scalar_prefetch=0,
            grid=(pl.cdiv(M, tm),),
            in_specs=[
                pl.BlockSpec((tm, C), lambda i: (i, 0)),    # attention output tile
                pl.BlockSpec((C, C), lambda i: (0, 0)),     # proj weight (resident)
                pl.BlockSpec((1, C), lambda i: (0, 0)),     # proj bias
                pl.BlockSpec((tm, C), lambda i: (i, 0)),    # shortcut tile
                pl.BlockSpec((1, C), lambda i: (0, 0)),     # norm2 gamma
                pl.BlockSpec((1, C), lambda i: (0, 0)),     # norm2 beta
                pl.BlockSpec((C, Nh), lambda i: (0, 0)),    # fc1 weight (resident)
                pl.BlockSpec((1, Nh), lambda i: (0, 0)),    # fc1 bias
            ],
            out_specs=[
                pl.BlockSpec((tm, C), lambda i: (i, 0)),    # x2
                pl.BlockSpec((tm, Nh), lambda i: (i, 0)),   # h
            ],
        ),
        compiler_params=pltpu.CompilerParams(
            dimension_semantics=("parallel",),
            vmem_limit_bytes=_VMEM_LIMIT),
        cost_estimate=cost,
    )(a, wp, bp.reshape(1, C), residual, gamma.reshape(1, C), beta.reshape(1, C),
      w1, b1.reshape(1, Nh))


# ----------------------------------------------------------------------------
# kernel 4: matmul + bias + residual (optional K-axis tiling, f32 accumulator)
# ----------------------------------------------------------------------------
def _matmul_bias_res_kernel(x_ref, w_ref, b_ref, r_ref, o_ref, acc_ref):
    kk = pl.program_id(1)

    @pl.when(kk == 0)
    def _():
        acc_ref[...] = jnp.zeros(acc_ref.shape, acc_ref.dtype)

    acc_ref[...] += jnp.dot(x_ref[...], w_ref[...], preferred_element_type=jnp.float32)

    @pl.when(kk == pl.num_programs(1) - 1)
    def _():
        o_ref[...] = (acc_ref[...] + b_ref[...].astype(jnp.float32)
                      + r_ref[...].astype(jnp.float32)).astype(o_ref.dtype)


def matmul_bias_residual(x, w, b, residual, *, tm_cap=512, tk_cap=2048):
    """out = x @ w + b + residual. x:(M,K) w:(K,N) residual:(M,N)."""
    M, K = x.shape
    _, N = w.shape
    tm = _pick_row_tile(M, tm_cap)
    tk = _pick_col_tile(K, tk_cap)
    grid = (pl.cdiv(M, tm), pl.cdiv(K, tk))
    bpe_x = jnp.dtype(x.dtype).itemsize
    bpe_w = jnp.dtype(w.dtype).itemsize
    w_reads = K * N if grid[1] == 1 else grid[0] * K * N
    cost = pl.CostEstimate(
        flops=2 * M * K * N + 2 * M * N,
        transcendentals=0,
        bytes_accessed=bpe_x * (M * K + 2 * M * N) + bpe_w * w_reads + 4 * N,
    )
    return pl.pallas_call(
        _matmul_bias_res_kernel,
        out_shape=jax.ShapeDtypeStruct((M, N), x.dtype),
        grid_spec=pltpu.PrefetchScalarGridSpec(
            num_scalar_prefetch=0,
            grid=grid,
            in_specs=[
                pl.BlockSpec((tm, tk), lambda i, kk: (i, kk)),   # activations tile
                pl.BlockSpec((tk, N), lambda i, kk: (kk, 0)),    # weight K tile
                pl.BlockSpec((1, N), lambda i, kk: (0, 0)),      # bias (resident)
                pl.BlockSpec((tm, N), lambda i, kk: (i, 0)),     # residual tile
            ],
            out_specs=pl.BlockSpec((tm, N), lambda i, kk: (i, 0)),
            scratch_shapes=[pltpu.VMEM((tm, N), jnp.float32)],
        ),
        compiler_params=pltpu.CompilerParams(
            dimension_semantics=("parallel", "arbitrary"),
            vmem_limit_bytes=_VMEM_LIMIT),
        cost_estimate=cost,
    )(x, w, b.reshape(1, N), residual)


# ----------------------------------------------------------------------------
# Block forward (eval semantics).  Weights stored as (in, out): PyTorch Linear
# weights (out, in) map here as W.T.
# ----------------------------------------------------------------------------
def block_forward(x, params, *, num_heads, eps=1e-6, fuse_proj_mlp=True):
    B, H, W, C = x.shape
    N = H * W
    M = B * N
    dh = C // num_heads
    x2 = x.reshape(M, C)
    shortcut = x2

    # norm1 + qkv projection (single fused kernel)
    qkv = ln_matmul(x2, params["norm1_g"], params["norm1_b"],
                    params["qkv_w"], params["qkv_b"], eps=eps)        # (M, 3C)
    # pure reshape (no transpose / extra HBM pass)
    qkv = qkv.reshape(B, N, 3, num_heads, dh)

    # attention: heads sliced via BlockSpec index maps; output written directly in
    # (B, N, heads, dh) layout -> no XLA transposes on either side.
    attn = flash_attention(qkv, scale=dh ** -0.5)                     # (B, N, heads, dh)
    attn = attn.reshape(M, C)                                         # pure reshape

    if fuse_proj_mlp:
        # attn.proj + residual fused with norm2 + mlp.fc1 + GELU
        x2, h = attn_proj_mlp_fc1(attn, params["proj_w"], params["proj_b"], shortcut,
                                  params["norm2_g"], params["norm2_b"],
                                  params["fc1_w"], params["fc1_b"], eps=eps)
    else:
        x2 = matmul_bias_residual(attn, params["proj_w"], params["proj_b"], shortcut)
        h = ln_matmul(x2, params["norm2_g"], params["norm2_b"],
                      params["fc1_w"], params["fc1_b"], activation="gelu", eps=eps)

    # mlp.fc2 + residual (drop_path / dropout are identity in eval)
    out = matmul_bias_residual(h, params["fc2_w"], params["fc2_b"], x2)
    return out.reshape(B, H, W, C)


# ----------------------------------------------------------------------------
# pure-JAX reference (same math as the PyTorch Block in eval mode)
# ----------------------------------------------------------------------------
def ref_block_forward(x, params, *, num_heads, eps=1e-6):
    B, H, W, C = x.shape
    N = H * W
    dh = C // num_heads
    xf = x.reshape(B, N, C).astype(jnp.float32)

    def ln(t, g, b):
        mu = jnp.mean(t, axis=-1, keepdims=True)
        var = jnp.mean((t - mu) ** 2, axis=-1, keepdims=True)
        return (t - mu) * jax.lax.rsqrt(var + eps) * g + b

    shortcut = xf
    t = ln(xf, params["norm1_g"], params["norm1_b"])
    qkv = t @ params["qkv_w"] + params["qkv_b"]
    qkv = qkv.reshape(B, N, 3, num_heads, dh).transpose(2, 0, 3, 1, 4)
    q, k, v = qkv[0], qkv[1], qkv[2]
    s = jnp.einsum("bhqd,bhkd->bhqk", q, k) * (dh ** -0.5)
    p = jax.nn.softmax(s, axis=-1)
    a = jnp.einsum("bhqk,bhkd->bhqd", p, v)
    a = a.transpose(0, 2, 1, 3).reshape(B, N, C)
    xf = shortcut + (a @ params["proj_w"] + params["proj_b"])
    t = ln(xf, params["norm2_g"], params["norm2_b"])
    hdn = jax.nn.gelu(t @ params["fc1_w"] + params["fc1_b"], approximate=True)
    xf = xf + (hdn @ params["fc2_w"] + params["fc2_b"])
    return xf.reshape(B, H, W, C)


if __name__ == "__main__":
    B, Hs, Ws, C = 2, 4, 4, 32
    num_heads = 4
    hidden = int(C * 4.0)

    key = jax.random.PRNGKey(0)
    keys = jax.random.split(key, 13)
    x = jax.random.normal(keys[0], (B, Hs, Ws, C), dtype=jnp.float32)
    params = dict(
        norm1_g=1.0 + 0.1 * jax.random.normal(keys[1], (C,), jnp.float32),
        norm1_b=0.1 * jax.random.normal(keys[2], (C,), jnp.float32),
        qkv_w=0.02 * jax.random.normal(keys[3], (C, 3 * C), jnp.float32),
        qkv_b=jnp.zeros((3 * C,), jnp.float32),
        proj_w=0.02 * jax.random.normal(keys[4], (C, C), jnp.float32),
        proj_b=0.02 * jax.random.normal(keys[5], (C,), jnp.float32),
        norm2_g=1.0 + 0.1 * jax.random.normal(keys[6], (C,), jnp.float32),
        norm2_b=0.1 * jax.random.normal(keys[7], (C,), jnp.float32),
        fc1_w=0.02 * jax.random.normal(keys[8], (C, hidden), jnp.float32),
        fc1_b=0.02 * jax.random.normal(keys[9], (hidden,), jnp.float32),
        fc2_w=0.02 * jax.random.normal(keys[10], (hidden, C), jnp.float32),
        fc2_b=0.02 * jax.random.normal(keys[11], (C,), jnp.float32),
    )

    ref = ref_block_forward(x, params, num_heads=num_heads)

    # fused proj+MLP path (default)
    fwd = jax.jit(functools.partial(block_forward, num_heads=num_heads))
    out = fwd(x, params)
    jax.block_until_ready(out)
    assert out.shape == ref.shape == (B, Hs, Ws, C)
    err = float(jnp.max(jnp.abs(out - ref)))
    assert jnp.allclose(out, ref, atol=2e-3, rtol=2e-3), f"fused max abs err {err}"

    # unfused path (used on v7x when fc1/fc2 weights need N/K tiling)
    fwd_uf = jax.jit(functools.partial(block_forward, num_heads=num_heads,
                                       fuse_proj_mlp=False))
    out_uf = fwd_uf(x, params)
    jax.block_until_ready(out_uf)
    err_uf = float(jnp.max(jnp.abs(out_uf - ref)))
    assert jnp.allclose(out_uf, ref, atol=2e-3, rtol=2e-3), f"unfused max abs err {err_uf}"

    print("KERNEL_OK")
</pallas_src>

<mosaic_0001>
module attributes {stable_mosaic.version = 11 : i64} {
  func.func @_ln_matmul_kernel(%arg0: i32, %arg1: i32, %arg2: memref<32x32xf32, #tpu.memory_space<vmem>>, %arg3: memref<1x32xf32, #tpu.memory_space<vmem>>, %arg4: memref<1x32xf32, #tpu.memory_space<vmem>>, %arg5: memref<32x96xf32, #tpu.memory_space<vmem>>, %arg6: memref<1x96xf32, #tpu.memory_space<vmem>>, %arg7: memref<32x96xf32, #tpu.memory_space<vmem>>, %arg8: memref<32x32xf32, #tpu.memory_space<vmem>>) attributes {dimension_semantics = [#tpu.dimension_semantics<parallel>, #tpu.dimension_semantics<arbitrary>], iteration_bounds = array<i64: 1, 1>, scalar_prefetch = 0 : i64, scratch_operands = 1 : i64, tpu.core_type = #tpu.core_type<tc>, window_params = [{transform_indices = @transform_0, window_bounds = array<i64: 32, 32>}, {pipeline_mode = #tpu.pipeline_mode<synchronous>, transform_indices = @transform_1, window_bounds = array<i64: 1, 32>}, {pipeline_mode = #tpu.pipeline_mode<synchronous>, transform_indices = @transform_2, window_bounds = array<i64: 1, 32>}, {transform_indices = @transform_3, window_bounds = array<i64: 32, 96>}, {transform_indices = @transform_4, window_bounds = array<i64: 1, 96>}, {transform_indices = @transform_5, window_bounds = array<i64: 32, 96>}]} {
    %c0_i32 = arith.constant 0 : i32
    %0 = arith.cmpi eq, %arg1, %c0_i32 : i32
    %1 = arith.extui %0 : i1 to i32
    %c0_i32_0 = arith.constant 0 : i32
    %2 = arith.cmpi ne, %1, %c0_i32_0 : i32
    scf.if %2 {
      %c0_8 = arith.constant 0 : index
      %c0_9 = arith.constant 0 : index
      %10 = vector.load %arg2[%c0_8, %c0_9] : memref<32x32xf32, #tpu.memory_space<vmem>>, vector<32x32xf32>
      %cst_10 = arith.constant dense<0.000000e+00> : vector<32xf32>
      %11 = vector.multi_reduction <add>, %10, %cst_10 [1] : vector<32x32xf32> to vector<32xf32>
      %12 = vector.shape_cast %11 : vector<32xf32> to vector<32x1xf32>
      %cst_11 = arith.constant 3.200000e+01 : f32
      %13 = vector.broadcast %cst_11 : f32 to vector<32x1xf32>
      %14 = arith.divf %12, %13 : vector<32x1xf32>
      %15 = vector.broadcast %14 : vector<32x1xf32> to vector<32x32xf32>
      %16 = arith.subf %10, %15 : vector<32x32xf32>
      %17 = arith.mulf %16, %16 : vector<32x32xf32>
      %cst_12 = arith.constant dense<0.000000e+00> : vector<32xf32>
      %18 = vector.multi_reduction <add>, %17, %cst_12 [1] : vector<32x32xf32> to vector<32xf32>
      %19 = vector.shape_cast %18 : vector<32xf32> to vector<32x1xf32>
      %cst_13 = arith.constant 3.200000e+01 : f32
      %20 = vector.broadcast %cst_13 : f32 to vector<32x1xf32>
      %21 = arith.divf %19, %20 : vector<32x1xf32>
      %cst_14 = arith.constant 9.99999997E-7 : f32
      %22 = vector.broadcast %cst_14 : f32 to vector<32x1xf32>
      %23 = arith.addf %21, %22 : vector<32x1xf32>
      %24 = math.rsqrt %23 : vector<32x1xf32>
      %25 = vector.broadcast %24 : vector<32x1xf32> to vector<32x32xf32>
      %26 = arith.mulf %16, %25 : vector<32x32xf32>
      %c0_15 = arith.constant 0 : index
      %c0_16 = arith.constant 0 : index
      %27 = vector.load %arg3[%c0_15, %c0_16] : memref<1x32xf32, #tpu.memory_space<vmem>>, vector<1x32xf32>
      %28 = vector.broadcast %27 : vector<1x32xf32> to vector<32x32xf32>
      %29 = arith.mulf %26, %28 : vector<32x32xf32>
      %c0_17 = arith.constant 0 : index
      %c0_18 = arith.constant 0 : index
      %30 = vector.load %arg4[%c0_17, %c0_18] : memref<1x32xf32, #tpu.memory_space<vmem>>, vector<1x32xf32>
      %31 = vector.broadcast %30 : vector<1x32xf32> to vector<32x32xf32>
      %32 = arith.addf %29, %31 : vector<32x32xf32>
      %c0_19 = arith.constant 0 : index
      %c0_20 = arith.constant 0 : index
      %33 = vector.load %arg8[%c0_19, %c0_20] : memref<32x32xf32, #tpu.memory_space<vmem>>, vector<32x32xf32>
      tpu.vector_store %arg8[%c0_19, %c0_20], %32 {strides = array<i32>} : memref<32x32xf32, #tpu.memory_space<vmem>>, vector<32x32xf32>,
    } else {
    }
    %c0 = arith.constant 0 : index
    %c0_1 = arith.constant 0 : index
    %3 = vector.load %arg8[%c0, %c0_1] : memref<32x32xf32, #tpu.memory_space<vmem>>, vector<32x32xf32>
    %c0_2 = arith.constant 0 : index
    %c0_3 = arith.constant 0 : index
    %4 = vector.load %arg5[%c0_2, %c0_3] : memref<32x96xf32, #tpu.memory_space<vmem>>, vector<32x96xf32>
    %cst = arith.constant dense<0.000000e+00> : vector<32x96xf32>
    %5 = tpu.matmul %3, %4, %cst {dimension_numbers = #tpu.dot_dimension_numbers<[1], [0], [0], [1], [0, 0, 1, 1], [], []>} : vector<32x32xf32>, vector<32x96xf32>, vector<32x96xf32> -> vector<32x96xf32>
    %c0_4 = arith.constant 0 : index
    %c0_5 = arith.constant 0 : index
    %6 = vector.load %arg6[%c0_4, %c0_5] : memref<1x96xf32, #tpu.memory_space<vmem>>, vector<1x96xf32>
    %7 = vector.broadcast %6 : vector<1x96xf32> to vector<32x96xf32>
    %8 = arith.addf %5, %7 : vector<32x96xf32>
    %c0_6 = arith.constant 0 : index
    %c0_7 = arith.constant 0 : index
    %9 = vector.load %arg7[%c0_6, %c0_7] : memref<32x96xf32, #tpu.memory_space<vmem>>, vector<32x96xf32>
    tpu.vector_store %arg7[%c0_6, %c0_7], %8 {strides = array<i32>} : memref<32x96xf32, #tpu.memory_space<vmem>>, vector<32x96xf32>,
    return
  }
  func.func @transform_0(%arg0: i32, %arg1: i32) -> (i32, i32) {
    %c0_i32 = arith.constant 0 : i32
    %c0_i32_0 = arith.constant 0 : i32
    return %arg0, %c0_i32 : i32, i32
  }
  func.func @transform_1(%arg0: i32, %arg1: i32) -> (i32, i32) {
    %c0_i32 = arith.constant 0 : i32
    %c0_i32_0 = arith.constant 0 : i32
    %c0_i32_1 = arith.constant 0 : i32
    return %c0_i32, %c0_i32_0 : i32, i32
  }
  func.func @transform_2(%arg0: i32, %arg1: i32) -> (i32, i32) {
    %c0_i32 = arith.constant 0 : i32
    %c0_i32_0 = arith.constant 0 : i32
    %c0_i32_1 = arith.constant 0 : i32
    return %c0_i32, %c0_i32_0 : i32, i32
  }
  func.func @transform_3(%arg0: i32, %arg1: i32) -> (i32, i32) {
    %c0_i32 = arith.constant 0 : i32
    %c0_i32_0 = arith.constant 0 : i32
    return %c0_i32, %arg1 : i32, i32
  }
  func.func @transform_4(%arg0: i32, %arg1: i32) -> (i32, i32) {
    %c0_i32 = arith.constant 0 : i32
    %c0_i32_0 = arith.constant 0 : i32
    return %c0_i32, %arg1 : i32, i32
  }
  func.func @transform_5(%arg0: i32, %arg1: i32) -> (i32, i32) {
    %c0_i32 = arith.constant 0 : i32
    return %arg0, %arg1 : i32, i32
  }
}

module attributes {stable_mosaic.version = 11 : i64} {
  func.func @_flash_attn_kernel(%arg0: i32, %arg1: i32, %arg2: i32, %arg3: i32, %arg4: memref<1x16x1x4x8xf32, #tpu.memory_space<vmem>>, %arg5: memref<1x16x1x4x8xf32, #tpu.memory_space<vmem>>, %arg6: memref<1x16x1x4x8xf32, #tpu.memory_space<vmem>>, %arg7: memref<1x16x4x8xf32, #tpu.memory_space<vmem>>, %arg8: memref<4x16x1xf32, #tpu.memory_space<vmem>>, %arg9: memref<4x16x1xf32, #tpu.memory_space<vmem>>, %arg10: memref<4x16x8xf32, #tpu.memory_space<vmem>>) attributes {dimension_semantics = [#tpu.dimension_semantics<parallel>, #tpu.dimension_semantics<parallel>, #tpu.dimension_semantics<parallel>, #tpu.dimension_semantics<arbitrary>], iteration_bounds = array<i64: 2, 1, 1, 1>, scalar_prefetch = 0 : i64, scratch_operands = 3 : i64, tpu.core_type = #tpu.core_type<tc>, window_params = [{transform_indices = @transform_0, window_bounds = array<i64: 1, 16, 1, 4, 8>}, {transform_indices = @transform_1, window_bounds = array<i64: 1, 16, 1, 4, 8>}, {transform_indices = @transform_2, window_bounds = array<i64: 1, 16, 1, 4, 8>}, {transform_indices = @transform_3, window_bounds = array<i64: 1, 16, 4, 8>}]} {
    %c0_i32 = arith.constant 0 : i32
    %0 = arith.cmpi eq, %arg3, %c0_i32 : i32
    %1 = arith.extui %0 : i1 to i32
    %c0_i32_0 = arith.constant 0 : i32
    %2 = arith.cmpi ne, %1, %c0_i32_0 : i32
    scf.if %2 {
      %cst_39 = arith.constant 0xFF800000 : f32
      %40 = vector.broadcast %cst_39 : f32 to vector<4x16x1xf32>
      %c0_40 = arith.constant 0 : index
      %c0_41 = arith.constant 0 : index
      %c0_42 = arith.constant 0 : index
      %41 = vector.load %arg8[%c0_40, %c0_41, %c0_42] : memref<4x16x1xf32, #tpu.memory_space<vmem>>, vector<4x16x1xf32>
      tpu.vector_store %arg8[%c0_40, %c0_41, %c0_42], %40 {strides = array<i32>} : memref<4x16x1xf32, #tpu.memory_space<vmem>>, vector<4x16x1xf32>,
      %cst_43 = arith.constant 0.000000e+00 : f32
      %42 = vector.broadcast %cst_43 : f32 to vector<4x16x1xf32>
      %c0_44 = arith.constant 0 : index
      %c0_45 = arith.constant 0 : index
      %c0_46 = arith.constant 0 : index
      %43 = vector.load %arg9[%c0_44, %c0_45, %c0_46] : memref<4x16x1xf32, #tpu.memory_space<vmem>>, vector<4x16x1xf32>
      tpu.vector_store %arg9[%c0_44, %c0_45, %c0_46], %42 {strides = array<i32>} : memref<4x16x1xf32, #tpu.memory_space<vmem>>, vector<4x16x1xf32>,
      %cst_47 = arith.constant 0.000000e+00 : f32
      %44 = vector.broadcast %cst_47 : f32 to vector<4x16x8xf32>
      %c0_48 = arith.constant 0 : index
      %c0_49 = arith.constant 0 : index
      %c0_50 = arith.constant 0 : index
      %45 = vector.load %arg10[%c0_48, %c0_49, %c0_50] : memref<4x16x8xf32, #tpu.memory_space<vmem>>, vector<4x16x8xf32>
      tpu.vector_store %arg10[%c0_48, %c0_49, %c0_50], %44 {strides = array<i32>} : memref<4x16x8xf32, #tpu.memory_space<vmem>>, vector<4x16x8xf32>,
    } else {
    }
    %c0 = arith.constant 0 : index
    %c0_1 = arith.constant 0 : index
    %c0_2 = arith.constant 0 : index
    %c0_3 = arith.constant 0 : index
    %c0_4 = arith.constant 0 : index
    %3 = vector.load %arg4[%c0, %c0_1, %c0_2, %c0_3, %c0_4] : memref<1x16x1x4x8xf32, #tpu.memory_space<vmem>>, vector<1x16x1x4x8xf32>
    %4 = vector.shape_cast %3 : vector<1x16x1x4x8xf32> to vector<16x4x8xf32>
    %5 = tpu.transpose %4, [1, 0, 2] : vector<16x4x8xf32> -> vector<4x16x8xf32>
    %c0_5 = arith.constant 0 : index
    %c0_6 = arith.constant 0 : index
    %c0_7 = arith.constant 0 : index
    %c0_8 = arith.constant 0 : index
    %c0_9 = arith.constant 0 : index
    %6 = vector.load %arg5[%c0_5, %c0_6, %c0_7, %c0_8, %c0_9] : memref<1x16x1x4x8xf32, #tpu.memory_space<vmem>>, vector<1x16x1x4x8xf32>
    %7 = vector.shape_cast %6 : vector<1x16x1x4x8xf32> to vector<16x4x8xf32>
    %8 = tpu.transpose %7, [1, 0, 2] : vector<16x4x8xf32> -> vector<4x16x8xf32>
    %c0_10 = arith.constant 0 : index
    %c0_11 = arith.constant 0 : index
    %c0_12 = arith.constant 0 : index
    %c0_13 = arith.constant 0 : index
    %c0_14 = arith.constant 0 : index
    %9 = vector.load %arg6[%c0_10, %c0_11, %c0_12, %c0_13, %c0_14] : memref<1x16x1x4x8xf32, #tpu.memory_space<vmem>>, vector<1x16x1x4x8xf32>
    %10 = vector.shape_cast %9 : vector<1x16x1x4x8xf32> to vector<16x4x8xf32>
    %11 = tpu.transpose %10, [1, 0, 2] : vector<16x4x8xf32> -> vector<4x16x8xf32>
    "tpu.trace_start"() <{level = 10 : i32, message = "hqd,hkd->hqk"}> : () -> ()
    %cst = arith.constant dense<0.000000e+00> : vector<4x16x16xf32>
    %12 = tpu.matmul %5, %8, %cst {dimension_numbers = #tpu.dot_dimension_numbers<[2], [2], [1], [1], [0, 0, 0, 1, 1, 1], [0], [0]>} : vector<4x16x8xf32>, vector<4x16x8xf32>, vector<4x16x16xf32> -> vector<4x16x16xf32>
    "tpu.trace_stop"() : () -> ()
    %cst_15 = arith.constant 0.353553385 : f32
    %13 = vector.broadcast %cst_15 : f32 to vector<4x16x16xf32>
    %14 = arith.mulf %12, %13 : vector<4x16x16xf32>
    %c0_16 = arith.constant 0 : index
    %c0_17 = arith.constant 0 : index
    %c0_18 = arith.constant 0 : index
    %15 = vector.load %arg8[%c0_16, %c0_17, %c0_18] : memref<4x16x1xf32, #tpu.memory_space<vmem>>, vector<4x16x1xf32>
    %cst_19 = arith.constant dense<0xFF800000> : vector<4x16xf32>
    %16 = vector.multi_reduction <maximumf>, %14, %cst_19 [2] : vector<4x16x16xf32> to vector<4x16xf32>
    %17 = vector.shape_cast %16 : vector<4x16xf32> to vector<4x16x1xf32>
    %18 = arith.maximumf %15, %17 : vector<4x16x1xf32>
    %19 = arith.subf %15, %18 : vector<4x16x1xf32>
    %20 = math.exp %19 : vector<4x16x1xf32>
    %21 = vector.broadcast %18 : vector<4x16x1xf32> to vector<4x16x16xf32>
    %22 = arith.subf %14, %21 : vector<4x16x16xf32>
    %23 = math.exp %22 : vector<4x16x16xf32>
    %c0_20 = arith.constant 0 : index
    %c0_21 = arith.constant 0 : index
    %c0_22 = arith.constant 0 : index
    %24 = vector.load %arg9[%c0_20, %c0_21, %c0_22] : memref<4x16x1xf32, #tpu.memory_space<vmem>>, vector<4x16x1xf32>
    %25 = arith.mulf %20, %24 : vector<4x16x1xf32>
    %cst_23 = arith.constant dense<0.000000e+00> : vector<4x16xf32>
    %26 = vector.multi_reduction <add>, %23, %cst_23 [2] : vector<4x16x16xf32> to vector<4x16xf32>
    %27 = vector.shape_cast %26 : vector<4x16xf32> to vector<4x16x1xf32>
    %28 = arith.addf %25, %27 : vector<4x16x1xf32>
    %c0_24 = arith.constant 0 : index
    %c0_25 = arith.constant 0 : index
    %c0_26 = arith.constant 0 : index
    %29 = vector.load %arg9[%c0_24, %c0_25, %c0_26] : memref<4x16x1xf32, #tpu.memory_space<vmem>>, vector<4x16x1xf32>
    tpu.vector_store %arg9[%c0_24, %c0_25, %c0_26], %28 {strides = array<i32>} : memref<4x16x1xf32, #tpu.memory_space<vmem>>, vector<4x16x1xf32>,
    %c0_27 = arith.constant 0 : index
    %c0_28 = arith.constant 0 : index
    %c0_29 = arith.constant 0 : index
    %30 = vector.load %arg10[%c0_27, %c0_28, %c0_29] : memref<4x16x8xf32, #tpu.memory_space<vmem>>, vector<4x16x8xf32>
    %31 = vector.broadcast %20 : vector<4x16x1xf32> to vector<4x16x8xf32>
    %32 = arith.mulf %31, %30 : vector<4x16x8xf32>
    "tpu.trace_start"() <{level = 10 : i32, message = "hqk,hkd->hqd"}> : () -> ()
    %cst_30 = arith.constant dense<0.000000e+00> : vector<4x16x8xf32>
    %33 = tpu.matmul %23, %11, %cst_30 {dimension_numbers = #tpu.dot_dimension_numbers<[2], [1], [1], [2], [0, 0, 0, 1, 1, 2], [0], [0]>} : vector<4x16x16xf32>, vector<4x16x8xf32>, vector<4x16x8xf32> -> vector<4x16x8xf32>
    "tpu.trace_stop"() : () -> ()
    %34 = arith.addf %32, %33 : vector<4x16x8xf32>
    %c0_31 = arith.constant 0 : index
    %c0_32 = arith.constant 0 : index
    %c0_33 = arith.constant 0 : index
    %35 = vector.load %arg10[%c0_31, %c0_32, %c0_33] : memref<4x16x8xf32, #tpu.memory_space<vmem>>, vector<4x16x8xf32>
    tpu.vector_store %arg10[%c0_31, %c0_32, %c0_33], %34 {strides = array<i32>} : memref<4x16x8xf32, #tpu.memory_space<vmem>>, vector<4x16x8xf32>,
    %c0_34 = arith.constant 0 : index
    %c0_35 = arith.constant 0 : index
    %c0_36 = arith.constant 0 : index
    %36 = vector.load %arg8[%c0_34, %c0_35, %c0_36] : memref<4x16x1xf32, #tpu.memory_space<vmem>>, vector<4x16x1xf32>
    tpu.vector_store %arg8[%c0_34, %c0_35, %c0_36], %18 {strides = array<i32>} : memref<4x16x1xf32, #tpu.memory_space<vmem>>, vector<4x16x1xf32>,
    %c0_i32_37 = arith.constant 0 : i32
    %37 = arith.cmpi eq, %arg3, %c0_i32_37 : i32
    %38 = arith.extui %37 : i1 to i32
    %c0_i32_38 = arith.constant 0 : i32
    %39 = arith.cmpi ne, %38, %c0_i32_38 : i32
    scf.if %39 {
      %c0_39 = arith.constant 0 : index
      %c0_40 = arith.constant 0 : index
      %c0_41 = arith.constant 0 : index
      %40 = vector.load %arg10[%c0_39, %c0_40, %c0_41] : memref<4x16x8xf32, #tpu.memory_space<vmem>>, vector<4x16x8xf32>
      %c0_42 = arith.constant 0 : index
      %c0_43 = arith.constant 0 : index
      %c0_44 = arith.constant 0 : index
      %41 = vector.load %arg9[%c0_42, %c0_43, %c0_44] : memref<4x16x1xf32, #tpu.memory_space<vmem>>, vector<4x16x1xf32>
      %42 = tpu.reciprocal %41 {approx = true} : vector<4x16x1xf32> -> vector<4x16x1xf32>
      %43 = vector.broadcast %42 : vector<4x16x1xf32> to vector<4x16x8xf32>
      %44 = arith.mulf %40, %43 : vector<4x16x8xf32>
      %45 = tpu.transpose %44, [1, 0, 2] : vector<4x16x8xf32> -> vector<16x4x8xf32>
      %c0_45 = arith.constant 0 : index
      %c0_46 = arith.constant 0 : index
      %c0_47 = arith.constant 0 : index
      %c0_48 = arith.constant 0 : index
      %46 = vector.load %arg7[%c0_45, %c0_46, %c0_47, %c0_48] : memref<1x16x4x8xf32, #tpu.memory_space<vmem>>, vector<1x16x4x8xf32>
      %47 = vector.shape_cast %46 : vector<1x16x4x8xf32> to vector<16x4x8xf32>
      %48 = vector.shape_cast %45 : vector<16x4x8xf32> to vector<1x16x4x8xf32>
      tpu.vector_store %arg7[%c0_45, %c0_46, %c0_47, %c0_48], %48 {strides = array<i32>} : memref<1x16x4x8xf32, #tpu.memory_space<vmem>>, vector<1x16x4x8xf32>,
    } else {
    }
    return
  }
  func.func @transform_0(%arg0: i32, %arg1: i32, %arg2: i32, %arg3: i32) -> (i32, i32, i32, i32, i32) {
    %c0_i32 = arith.constant 0 : i32
    %c0_i32_0 = arith.constant 0 : i32
    %c0_i32_1 = arith.constant 0 : i32
    return %arg0, %arg2, %c0_i32, %arg1, %c0_i32_0 : i32, i32, i32, i32, i32
  }
  func.func @transform_1(%arg0: i32, %arg1: i32, %arg2: i32, %arg3: i32) -> (i32, i32, i32, i32, i32) {
    %c1_i32 = arith.constant 1 : i32
    %c0_i32 = arith.constant 0 : i32
    %c0_i32_0 = arith.constant 0 : i32
    return %arg0, %arg3, %c1_i32, %arg1, %c0_i32 : i32, i32, i32, i32, i32
  }
  func.func @transform_2(%arg0: i32, %arg1: i32, %arg2: i32, %arg3: i32) -> (i32, i32, i32, i32, i32) {
    %c2_i32 = arith.constant 2 : i32
    %c0_i32 = arith.constant 0 : i32
    %c0_i32_0 = arith.constant 0 : i32
    return %arg0, %arg3, %c2_i32, %arg1, %c0_i32 : i32, i32, i32, i32, i32
  }
  func.func @transform_3(%arg0: i32, %arg1: i32, %arg2: i32, %arg3: i32) -> (i32, i32, i32, i32) {
    %c0_i32 = arith.constant 0 : i32
    %c0_i32_0 = arith.constant 0 : i32
    return %arg0, %arg2, %arg1, %c0_i32 : i32, i32, i32, i32
  }
}

module attributes {stable_mosaic.version = 11 : i64} {
  func.func @_proj_res_ln_fc1_kernel(%arg0: i32, %arg1: memref<32x32xf32, #tpu.memory_space<vmem>>, %arg2: memref<32x32xf32, #tpu.memory_space<vmem>>, %arg3: memref<1x32xf32, #tpu.memory_space<vmem>>, %arg4: memref<32x32xf32, #tpu.memory_space<vmem>>, %arg5: memref<1x32xf32, #tpu.memory_space<vmem>>, %arg6: memref<1x32xf32, #tpu.memory_space<vmem>>, %arg7: memref<32x128xf32, #tpu.memory_space<vmem>>, %arg8: memref<1x128xf32, #tpu.memory_space<vmem>>, %arg9: memref<32x32xf32, #tpu.memory_space<vmem>>, %arg10: memref<32x128xf32, #tpu.memory_space<vmem>>) attributes {dimension_semantics = [#tpu.dimension_semantics<parallel>], iteration_bounds = array<i64: 1>, scalar_prefetch = 0 : i64, scratch_operands = 0 : i64, tpu.core_type = #tpu.core_type<tc>, window_params = [{transform_indices = @transform_0, window_bounds = array<i64: 32, 32>}, {pipeline_mode = #tpu.pipeline_mode<synchronous>, transform_indices = @transform_1, window_bounds = array<i64: 32, 32>}, {pipeline_mode = #tpu.pipeline_mode<synchronous>, transform_indices = @transform_2, window_bounds = array<i64: 1, 32>}, {transform_indices = @transform_3, window_bounds = array<i64: 32, 32>}, {pipeline_mode = #tpu.pipeline_mode<synchronous>, transform_indices = @transform_4, window_bounds = array<i64: 1, 32>}, {pipeline_mode = #tpu.pipeline_mode<synchronous>, transform_indices = @transform_5, window_bounds = array<i64: 1, 32>}, {pipeline_mode = #tpu.pipeline_mode<synchronous>, transform_indices = @transform_6, window_bounds = array<i64: 32, 128>}, {pipeline_mode = #tpu.pipeline_mode<synchronous>, transform_indices = @transform_7, window_bounds = array<i64: 1, 128>}, {transform_indices = @transform_8, window_bounds = array<i64: 32, 32>}, {transform_indices = @transform_9, window_bounds = array<i64: 32, 128>}]} {
    %c0 = arith.constant 0 : index
    %c0_0 = arith.constant 0 : index
    %0 = vector.load %arg1[%c0, %c0_0] : memref<32x32xf32, #tpu.memory_space<vmem>>, vector<32x32xf32>
    %c0_1 = arith.constant 0 : index
    %c0_2 = arith.constant 0 : index
    %1 = vector.load %arg2[%c0_1, %c0_2] : memref<32x32xf32, #tpu.memory_space<vmem>>, vector<32x32xf32>
    %cst = arith.constant dense<0.000000e+00> : vector<32x32xf32>
    %2 = tpu.matmul %0, %1, %cst {dimension_numbers = #tpu.dot_dimension_numbers<[1], [0], [0], [1], [0, 0, 1, 1], [], []>} : vector<32x32xf32>, vector<32x32xf32>, vector<32x32xf32> -> vector<32x32xf32>
    %c0_3 = arith.constant 0 : index
    %c0_4 = arith.constant 0 : index
    %3 = vector.load %arg3[%c0_3, %c0_4] : memref<1x32xf32, #tpu.memory_space<vmem>>, vector<1x32xf32>
    %4 = vector.broadcast %3 : vector<1x32xf32> to vector<32x32xf32>
    %5 = arith.addf %2, %4 : vector<32x32xf32>
    %c0_5 = arith.constant 0 : index
    %c0_6 = arith.constant 0 : index
    %6 = vector.load %arg4[%c0_5, %c0_6] : memref<32x32xf32, #tpu.memory_space<vmem>>, vector<32x32xf32>
    %7 = arith.addf %5, %6 : vector<32x32xf32>
    %c0_7 = arith.constant 0 : index
    %c0_8 = arith.constant 0 : index
    %8 = vector.load %arg9[%c0_7, %c0_8] : memref<32x32xf32, #tpu.memory_space<vmem>>, vector<32x32xf32>
    tpu.vector_store %arg9[%c0_7, %c0_8], %7 {strides = array<i32>} : memref<32x32xf32, #tpu.memory_space<vmem>>, vector<32x32xf32>,
    %cst_9 = arith.constant dense<0.000000e+00> : vector<32xf32>
    %9 = vector.multi_reduction <add>, %7, %cst_9 [1] : vector<32x32xf32> to vector<32xf32>
    %10 = vector.shape_cast %9 : vector<32xf32> to vector<32x1xf32>
    %cst_10 = arith.constant 3.200000e+01 : f32
    %11 = vector.broadcast %cst_10 : f32 to vector<32x1xf32>
    %12 = arith.divf %10, %11 : vector<32x1xf32>
    %13 = vector.broadcast %12 : vector<32x1xf32> to vector<32x32xf32>
    %14 = arith.subf %7, %13 : vector<32x32xf32>
    %15 = arith.mulf %14, %14 : vector<32x32xf32>
    %cst_11 = arith.constant dense<0.000000e+00> : vector<32xf32>
    %16 = vector.multi_reduction <add>, %15, %cst_11 [1] : vector<32x32xf32> to vector<32xf32>
    %17 = vector.shape_cast %16 : vector<32xf32> to vector<32x1xf32>
    %cst_12 = arith.constant 3.200000e+01 : f32
    %18 = vector.broadcast %cst_12 : f32 to vector<32x1xf32>
    %19 = arith.divf %17, %18 : vector<32x1xf32>
    %cst_13 = arith.constant 9.99999997E-7 : f32
    %20 = vector.broadcast %cst_13 : f32 to vector<32x1xf32>
    %21 = arith.addf %19, %20 : vector<32x1xf32>
    %22 = math.rsqrt %21 : vector<32x1xf32>
    %23 = vector.broadcast %22 : vector<32x1xf32> to vector<32x32xf32>
    %24 = arith.mulf %14, %23 : vector<32x32xf32>
    %c0_14 = arith.constant 0 : index
    %c0_15 = arith.constant 0 : index
    %25 = vector.load %arg5[%c0_14, %c0_15] : memref<1x32xf32, #tpu.memory_space<vmem>>, vector<1x32xf32>
    %26 = vector.broadcast %25 : vector<1x32xf32> to vector<32x32xf32>
    %27 = arith.mulf %24, %26 : vector<32x32xf32>
    %c0_16 = arith.constant 0 : index
    %c0_17 = arith.constant 0 : index
    %28 = vector.load %arg6[%c0_16, %c0_17] : memref<1x32xf32, #tpu.memory_space<vmem>>, vector<1x32xf32>
    %29 = vector.broadcast %28 : vector<1x32xf32> to vector<32x32xf32>
    %30 = arith.addf %27, %29 : vector<32x32xf32>
    %c0_18 = arith.constant 0 : index
    %c0_19 = arith.constant 0 : index
    %31 = vector.load %arg7[%c0_18, %c0_19] : memref<32x128xf32, #tpu.memory_space<vmem>>, vector<32x128xf32>
    %cst_20 = arith.constant dense<0.000000e+00> : vector<32x128xf32>
    %32 = tpu.matmul %30, %31, %cst_20 {dimension_numbers = #tpu.dot_dimension_numbers<[1], [0], [0], [1], [0, 0, 1, 1], [], []>} : vector<32x32xf32>, vector<32x128xf32>, vector<32x128xf32> -> vector<32x128xf32>
    %c0_21 = arith.constant 0 : index
    %c0_22 = arith.constant 0 : index
    %33 = vector.load %arg8[%c0_21, %c0_22] : memref<1x128xf32, #tpu.memory_space<vmem>>, vector<1x128xf32>
    %34 = vector.broadcast %33 : vector<1x128xf32> to vector<32x128xf32>
    %35 = arith.addf %32, %34 : vector<32x128xf32>
    %36 = arith.mulf %35, %35 : vector<32x128xf32>
    %37 = arith.mulf %35, %36 : vector<32x128xf32>
    %cst_23 = arith.constant 4.471500e-02 : f32
    %38 = vector.broadcast %cst_23 : f32 to vector<32x128xf32>
    %39 = arith.mulf %38, %37 : vector<32x128xf32>
    %40 = arith.addf %35, %39 : vector<32x128xf32>
    %cst_24 = arith.constant 0.797884583 : f32
    %41 = vector.broadcast %cst_24 : f32 to vector<32x128xf32>
    %42 = arith.mulf %41, %40 : vector<32x128xf32>
    %43 = math.tanh %42 : vector<32x128xf32>
    %cst_25 = arith.constant 1.000000e+00 : f32
    %44 = vector.broadcast %cst_25 : f32 to vector<32x128xf32>
    %45 = arith.addf %44, %43 : vector<32x128xf32>
    %cst_26 = arith.constant 5.000000e-01 : f32
    %46 = vector.broadcast %cst_26 : f32 to vector<32x128xf32>
    %47 = arith.mulf %46, %45 : vector<32x128xf32>
    %48 = arith.mulf %35, %47 : vector<32x128xf32>
    %c0_27 = arith.constant 0 : index
    %c0_28 = arith.constant 0 : index
    %49 = vector.load %arg10[%c0_27, %c0_28] : memref<32x128xf32, #tpu.memory_space<vmem>>, vector<32x128xf32>
    tpu.vector_store %arg10[%c0_27, %c0_28], %48 {strides = array<i32>} : memref<32x128xf32, #tpu.memory_space<vmem>>, vector<32x128xf32>,
    return
  }
  func.func @transform_0(%arg0: i32) -> (i32, i32) {
    %c0_i32 = arith.constant 0 : i32
    %c0_i32_0 = arith.constant 0 : i32
    return %arg0, %c0_i32 : i32, i32
  }
  func.func @transform_1(%arg0: i32) -> (i32, i32) {
    %c0_i32 = arith.constant 0 : i32
    %c0_i32_0 = arith.constant 0 : i32
    %c0_i32_1 = arith.constant 0 : i32
    return %c0_i32, %c0_i32_0 : i32, i32
  }
  func.func @transform_2(%arg0: i32) -> (i32, i32) {
    %c0_i32 = arith.constant 0 : i32
    %c0_i32_0 = arith.constant 0 : i32
    %c0_i32_1 = arith.constant 0 : i32
    return %c0_i32, %c0_i32_0 : i32, i32
  }
  func.func @transform_3(%arg0: i32) -> (i32, i32) {
    %c0_i32 = arith.constant 0 : i32
    %c0_i32_0 = arith.constant 0 : i32
    return %arg0, %c0_i32 : i32, i32
  }
  func.func @transform_4(%arg0: i32) -> (i32, i32) {
    %c0_i32 = arith.constant 0 : i32
    %c0_i32_0 = arith.constant 0 : i32
    %c0_i32_1 = arith.constant 0 : i32
    return %c0_i32, %c0_i32_0 : i32, i32
  }
  func.func @transform_5(%arg0: i32) -> (i32, i32) {
    %c0_i32 = arith.constant 0 : i32
    %c0_i32_0 = arith.constant 0 : i32
    %c0_i32_1 = arith.constant 0 : i32
    return %c0_i32, %c0_i32_0 : i32, i32
  }
  func.func @transform_6(%arg0: i32) -> (i32, i32) {
    %c0_i32 = arith.constant 0 : i32
    %c0_i32_0 = arith.constant 0 : i32
    %c0_i32_1 = arith.constant 0 : i32
    return %c0_i32, %c0_i32_0 : i32, i32
  }
  func.func @transform_7(%arg0: i32) -> (i32, i32) {
    %c0_i32 = arith.constant 0 : i32
    %c0_i32_0 = arith.constant 0 : i32
    %c0_i32_1 = arith.constant 0 : i32
    return %c0_i32, %c0_i32_0 : i32, i32
  }
  func.func @transform_8(%arg0: i32) -> (i32, i32) {
    %c0_i32 = arith.constant 0 : i32
    %c0_i32_0 = arith.constant 0 : i32
    return %arg0, %c0_i32 : i32, i32
  }
  func.func @transform_9(%arg0: i32) -> (i32, i32) {
    %c0_i32 = arith.constant 0 : i32
    %c0_i32_0 = arith.constant 0 : i32
    return %arg0, %c0_i32 : i32, i32
  }
}

module attributes {stable_mosaic.version = 11 : i64} {
  func.func @_matmul_bias_res_kernel(%arg0: i32, %arg1: i32, %arg2: memref<32x128xf32, #tpu.memory_space<vmem>>, %arg3: memref<128x32xf32, #tpu.memory_space<vmem>>, %arg4: memref<1x32xf32, #tpu.memory_space<vmem>>, %arg5: memref<32x32xf32, #tpu.memory_space<vmem>>, %arg6: memref<32x32xf32, #tpu.memory_space<vmem>>, %arg7: memref<32x32xf32, #tpu.memory_space<vmem>>) attributes {dimension_semantics = [#tpu.dimension_semantics<parallel>, #tpu.dimension_semantics<arbitrary>], iteration_bounds = array<i64: 1, 1>, scalar_prefetch = 0 : i64, scratch_operands = 1 : i64, tpu.core_type = #tpu.core_type<tc>, window_params = [{transform_indices = @transform_0, window_bounds = array<i64: 32, 128>}, {transform_indices = @transform_1, window_bounds = array<i64: 128, 32>}, {pipeline_mode = #tpu.pipeline_mode<synchronous>, transform_indices = @transform_2, window_bounds = array<i64: 1, 32>}, {transform_indices = @transform_3, window_bounds = array<i64: 32, 32>}, {transform_indices = @transform_4, window_bounds = array<i64: 32, 32>}]} {
    %c0_i32 = arith.constant 0 : i32
    %0 = arith.cmpi eq, %arg1, %c0_i32 : i32
    %1 = arith.extui %0 : i1 to i32
    %c0_i32_0 = arith.constant 0 : i32
    %2 = arith.cmpi ne, %1, %c0_i32_0 : i32
    scf.if %2 {
      %cst_10 = arith.constant 0.000000e+00 : f32
      %12 = vector.broadcast %cst_10 : f32 to vector<32x32xf32>
      %c0_11 = arith.constant 0 : index
      %c0_12 = arith.constant 0 : index
      %13 = vector.load %arg7[%c0_11, %c0_12] : memref<32x32xf32, #tpu.memory_space<vmem>>, vector<32x32xf32>
      tpu.vector_store %arg7[%c0_11, %c0_12], %12 {strides = array<i32>} : memref<32x32xf32, #tpu.memory_space<vmem>>, vector<32x32xf32>,
    } else {
    }
    %c0 = arith.constant 0 : index
    %c0_1 = arith.constant 0 : index
    %3 = vector.load %arg7[%c0, %c0_1] : memref<32x32xf32, #tpu.memory_space<vmem>>, vector<32x32xf32>
    %c0_2 = arith.constant 0 : index
    %c0_3 = arith.constant 0 : index
    %4 = vector.load %arg2[%c0_2, %c0_3] : memref<32x128xf32, #tpu.memory_space<vmem>>, vector<32x128xf32>
    %c0_4 = arith.constant 0 : index
    %c0_5 = arith.constant 0 : index
    %5 = vector.load %arg3[%c0_4, %c0_5] : memref<128x32xf32, #tpu.memory_space<vmem>>, vector<128x32xf32>
    %cst = arith.constant dense<0.000000e+00> : vector<32x32xf32>
    %6 = tpu.matmul %4, %5, %cst {dimension_numbers = #tpu.dot_dimension_numbers<[1], [0], [0], [1], [0, 0, 1, 1], [], []>} : vector<32x128xf32>, vector<128x32xf32>, vector<32x32xf32> -> vector<32x32xf32>
    %7 = arith.addf %3, %6 : vector<32x32xf32>
    %c0_6 = arith.constant 0 : index
    %c0_7 = arith.constant 0 : index
    %8 = vector.load %arg7[%c0_6, %c0_7] : memref<32x32xf32, #tpu.memory_space<vmem>>, vector<32x32xf32>
    tpu.vector_store %arg7[%c0_6, %c0_7], %7 {strides = array<i32>} : memref<32x32xf32, #tpu.memory_space<vmem>>, vector<32x32xf32>,
    %c0_i32_8 = arith.constant 0 : i32
    %9 = arith.cmpi eq, %arg1, %c0_i32_8 : i32
    %10 = arith.extui %9 : i1 to i32
    %c0_i32_9 = arith.constant 0 : i32
    %11 = arith.cmpi ne, %10, %c0_i32_9 : i32
    scf.if %11 {
      %c0_10 = arith.constant 0 : index
      %c0_11 = arith.constant 0 : index
      %12 = vector.load %arg7[%c0_10, %c0_11] : memref<32x32xf32, #tpu.memory_space<vmem>>, vector<32x32xf32>
      %c0_12 = arith.constant 0 : index
      %c0_13 = arith.constant 0 : index
      %13 = vector.load %arg4[%c0_12, %c0_13] : memref<1x32xf32, #tpu.memory_space<vmem>>, vector<1x32xf32>
      %14 = vector.broadcast %13 : vector<1x32xf32> to vector<32x32xf32>
      %15 = arith.addf %12, %14 : vector<32x32xf32>
      %c0_14 = arith.constant 0 : index
      %c0_15 = arith.constant 0 : index
      %16 = vector.load %arg5[%c0_14, %c0_15] : memref<32x32xf32, #tpu.memory_space<vmem>>, vector<32x32xf32>
      %17 = arith.addf %15, %16 : vector<32x32xf32>
      %c0_16 = arith.constant 0 : index
      %c0_17 = arith.constant 0 : index
      %18 = vector.load %arg6[%c0_16, %c0_17] : memref<32x32xf32, #tpu.memory_space<vmem>>, vector<32x32xf32>
      tpu.vector_store %arg6[%c0_16, %c0_17], %17 {strides = array<i32>} : memref<32x32xf32, #tpu.memory_space<vmem>>, vector<32x32xf32>,
    } else {
    }
    return
  }
  func.func @transform_0(%arg0: i32, %arg1: i32) -> (i32, i32) {
    %c0_i32 = arith.constant 0 : i32
    return %arg0, %arg1 : i32, i32
  }
  func.func @transform_1(%arg0: i32, %arg1: i32) -> (i32, i32) {
    %c0_i32 = arith.constant 0 : i32
    %c0_i32_0 = arith.constant 0 : i32
    return %arg1, %c0_i32 : i32, i32
  }
  func.func @transform_2(%arg0: i32, %arg1: i32) -> (i32, i32) {
    %c0_i32 = arith.constant 0 : i32
    %c0_i32_0 = arith.constant 0 : i32
    %c0_i32_1 = arith.constant 0 : i32
    return %c0_i32, %c0_i32_0 : i32, i32
  }
  func.func @transform_3(%arg0: i32, %arg1: i32) -> (i32, i32) {
    %c0_i32 = arith.constant 0 : i32
    %c0_i32_0 = arith.constant 0 : i32
    return %arg0, %c0_i32 : i32, i32
  }
  func.func @transform_4(%arg0: i32, %arg1: i32) -> (i32, i32) {
    %c0_i32 = arith.constant 0 : i32
    %c0_i32_0 = arith.constant 0 : i32
    return %arg0, %c0_i32 : i32, i32
  }
}

</mosaic_0001>

<bundles_post_ra>
// kernel: block_forward.4
= control target key start
LH: loop header
LB: loop body
LE: loop exit
PB: predicated region body
PF: predicated region fallthrough
CT: control target
= control target key end

     0   :  { %10 = vsyncpa [#allocation4], 0  ;;  %s425_s0 = inlined_call_operand.hbm [shape: f32[32,32], index: 0, kind: input, shape index: {}]   ;;  %s426_s1 = inlined_call_operand.vmem [shape: f32[1,32], index: 1, kind: input, shape index: {}]   ;;  %s427_s2 = inlined_call_operand.vmem [shape: f32[1,32], index: 2, kind: input, shape index: {}]   ;;  %s428_s3 = inlined_call_operand.hbm [shape: f32[32,96], index: 3, kind: input, shape index: {}]   ;;  %s429_s4 = inlined_call_operand.vmem [shape: f32[1,96], index: 4, kind: input, shape index: {}]   ;;  %s430_s5 = inlined_call_operand.vmem [shape: f32[32,96], index: 5, kind: output, shape index: {}]  }
   0x1   :  { %s16_s20 = sshll.u32 %s425_s0, 4  ;;  %s17_s20 = int_to_ptr.hbm [resolvable:$true] %s16_s20 }
   0x2   :  { %11 = vsyncpa [#allocation6], 0  ;;  %s327_s21 = smov [#allocation3]   ;;  %s33_s25 = sshll.u32 %s428_s3, 4  ;;  %s34_s25 = int_to_ptr.hbm [resolvable:$true] %s33_s25 }
   0x3   :  { %s18_s22 = sshll.u32 %s327_s21, 4  ;;  %s328_s26 = smov 128   ;;  %s19_s22 = int_to_ptr.vmem [resolvable:$true] %s18_s22 }
   0x4   :  { %s329_s27 = smov 8   ;;  %s330_s28 = smov [#allocation5]  }
   0x5   :  { %24 = dma.hbm_to_vmem [thread:$0]  %s17_s20, 512, %s19_s22, [#allocation4], %s328_s26, %s328_s26, %s329_s27  }
   0x6   :  { %s35_s29 = sshll.u32 %s330_s28, 4  ;;  %s36_s29 = int_to_ptr.vmem [resolvable:$true] %s35_s29 }
   0x7   :  { %41 = dma.hbm_to_vmem [thread:$0]  %s34_s25, 512, %s36_s29, [#allocation6], %s328_s26, %s328_s26, %s329_s27  }
   0x8   :  { %323 = dma.done.wait [#allocation4], 512  }
   0x9   :  { %324 = vsyncadd [#allocation4], 4294966784 }
   0xa   :  { %325 = dma.done.wait [#allocation6], 512  }
   0xb   :  { %326 = vsyncadd [#allocation6], 4294966784  ;;  %vm60_vm0 = vcmask 261120   ;;  %v58_v0 = vld [vmem:[#allocation3 + $0x10] sm:$0xff]  ;;  %v56_v1 = vld [vmem:[#allocation3] sm:$0xff]  ;;  %v331_v8 = vmov 32.0  }
   0xc   :  { %v67_v2 = vsel %vm60_vm0, %v58_v0, 0.0  ;;  %v61_v3 = vsel %vm60_vm0, %v56_v1, 0.0  ;;  %v59_v4 = vld [vmem:[#allocation3 + $0x18] sm:$0xff]  ;;  %v57_v5 = vld [vmem:[#allocation3 + $0x8] sm:$0xff]  ;;  %265 = vrcp.f32 %v331_v8  ;;  %v182_v38 = vld [vmem:[#allocation5 + $0x10] sm:$0xff]  ;;  %vm230_vm14 = vcmask 785408  }
   0xd   :  { %68 = vadd.xlane.f32.xlu0 %v67_v2  ;;  %62 = vadd.xlane.f32.xlu1 %v61_v3  ;;  %v70_v6 = vsel %vm60_vm0, %v59_v4, 0.0  ;;  %v64_v7 = vsel %vm60_vm0, %v57_v5, 0.0  ;;  %v183_v35 = vld [vmem:[#allocation5 + $0x18] sm:$0xff]  ;;  %v181_v41 = vld [vmem:[#allocation5 + $0x8] sm:$0xff]  ;;  %v180_v44 = vld [vmem:[#allocation5] sm:$0xff] }
   0xe   :  { %213 = vmatpush.msra.mxu0 %v183_v35  ;;  %246 = vmatpush.msra.mxu2 %v183_v35 }
   0xf   :  { %245 = vmatpush.msra.mxu1 %v183_v35  ;;  %247 = vmatpush.msra.mxu3 %v183_v35 }
  0x10   :  { %214 = vmatpush.msra.mxu0 %v182_v38  ;;  %249 = vmatpush.msra.mxu2 %v182_v38 }
  0x11   :  { %248 = vmatpush.msra.mxu1 %v182_v38  ;;  %250 = vmatpush.msra.mxu3 %v182_v38 }
  0x12   :  { %v266_v9 = vpop.eup %265  ;;  %215 = vmatpush.msra.mxu0 %v181_v41  ;;  %252 = vmatpush.msra.mxu2 %v181_v41 }
  0x13   :  { %v74_v10 = vmul.f32 32.0, %v266_v9  ;;  %vm78_vm1 = vweird.f32 %v266_v9  ;;  %251 = vmatpush.msra.mxu1 %v181_v41  ;;  %253 = vmatpush.msra.mxu3 %v181_v41 }
  0x14   :  { %216 = vmatpush.msra.mxu0 %v180_v44  ;;  %255 = vmatpush.msra.mxu2 %v180_v44 }
  0x15   :  { %71 = vadd.xlane.f32.xlu0 %v70_v6  ;;  %65 = vadd.xlane.f32.xlu1 %v64_v7  ;;  %v75_v11 = vsub.f32 1.0, %v74_v10  ;;  %v263_v6 = vld [vmem:[%s427_s2] ss:$0 sm:$0xff] }
  0x16   :  { %254 = vmatpush.msra.mxu1 %v180_v44  ;;  %256 = vmatpush.msra.mxu3 %v180_v44 }
  0x17   :  { %v76_v12 = vmul.f32 %v266_v9, %v75_v11 }
  0x19   :  { %v77_v13 = vadd.f32 %v266_v9, %v76_v12 }
  0x1b   :  { %v79_v14 = vsel %vm78_vm1, %v266_v9, %v77_v13 }
  0x80   :  { %v69_v15 = vpop.xlane.xlu0 %68  ;;  %v63_v16 = vpop.xlane.xlu1 %62 }
  0x81   :  { %v82_v17 = vmul.f32 %v79_v14, %v69_v15  ;;  %v80_v18 = vmul.f32 %v79_v14, %v63_v16 }
  0x83   :  { %v372_v19 = vsub.f32 %v58_v0, %v82_v17  ;;  %v374_v20 = vsub.f32 %v56_v1, %v80_v18  ;;  %v262_v1 = vld [vmem:[%s426_s1] ss:$0 sm:$0xff] }
  0x85   :  { %v90_v21 = vmul.f32 %v372_v19, %v372_v19  ;;  %v88_v22 = vmul.f32 %v374_v20, %v374_v20 }
  0x87   :  { %v98_v23 = vsel %vm60_vm0, %v90_v21, 0.0  ;;  %v92_v24 = vsel %vm60_vm0, %v88_v22, 0.0 }
  0x88   :  { %99 = vadd.xlane.f32.xlu2 %v98_v23  ;;  %v72_v25 = vpop.xlane.xlu0 %71  ;;  %93 = vadd.xlane.f32.xlu0 %v92_v24  ;;  %v66_v26 = vpop.xlane.xlu1 %65 }
  0x89   :  { %v83_v27 = vmul.f32 %v79_v14, %v72_v25  ;;  %v81_v28 = vmul.f32 %v79_v14, %v66_v26 }
  0x8b   :  { %v382_v29 = vsub.f32 %v59_v4, %v83_v27  ;;  %v384_v30 = vsub.f32 %v57_v5, %v81_v28 }
  0x8d   :  { %v91_v31 = vmul.f32 %v382_v29, %v382_v29  ;;  %v89_v32 = vmul.f32 %v384_v30, %v384_v30 }
  0x8f   :  { %v101_v33 = vsel %vm60_vm0, %v91_v31, 0.0  ;;  %v95_v34 = vsel %vm60_vm0, %v89_v32, 0.0 }
  0x90   :  { %102 = vadd.xlane.f32.xlu2 %v101_v33  ;;  %96 = vadd.xlane.f32.xlu1 %v95_v34 }
  0xfb   :  { %v100_v36 = vpop.xlane.xlu2 %99  ;;  %v94_v37 = vpop.xlane.xlu0 %93 }
  0xfc   :  { %v106_v39 = vmul.f32 %v100_v36, %v79_v14  ;;  %v104_v40 = vmul.f32 %v94_v37, %v79_v14 }
  0xfe   :  { %v110_v42 = vadd.f32 1e-06, %v106_v39  ;;  %v108_v43 = vadd.f32 1e-06, %v104_v40 }
 0x100   :  { %267 = vrsqrt.f32 %v110_v42  ;;  %vm118_vm3 = vweird.f32 %v108_v43  ;;  %vm138_vm5 = vweird.f32 %v110_v42 }
 0x101   :  { %269 = vrsqrt.f32 %v108_v43 }
 0x103   :  { %v103_v45 = vpop.xlane.xlu2 %102  ;;  %v97_v46 = vpop.xlane.xlu1 %96 }
 0x104   :  { %v107_v47 = vmul.f32 %v103_v45, %v79_v14  ;;  %v105_v48 = vmul.f32 %v97_v46, %v79_v14 }
 0x106   :  { %v268_v49 = vpop.eup %267  ;;  %v111_v50 = vadd.f32 1e-06, %v107_v47  ;;  %v109_v51 = vadd.f32 1e-06, %v105_v48 }
 0x107   :  { %v270_v52 = vpop.eup %269  ;;  %v133_v53 = vmul.f32 %v268_v49, %v110_v42  ;;  %vm139_vm2 = vweird.f32 %v268_v49 }
 0x108   :  { %v113_v54 = vmul.f32 %v270_v52, %v108_v43  ;;  %271 = vrsqrt.f32 %v111_v50  ;;  %vm119_vm4 = vweird.f32 %v270_v52  ;;  %vm140_vm6 = vmor %vm138_vm5, %vm139_vm2  ;;  %vm128_vm9 = vweird.f32 %v109_v51 }
 0x109   :  { %v134_v55 = vmul.f32 %v268_v49, %v133_v53  ;;  %273 = vrsqrt.f32 %v109_v51  ;;  %vm120_vm7 = vmor %vm118_vm3, %vm119_vm4  ;;  %vm148_vm11 = vweird.f32 %v111_v50 }
 0x10a   :  { %v114_v56 = vmul.f32 %v270_v52, %v113_v54 }
 0x10b   :  { %v135_v57 = vmul.f32 0.5, %v134_v55 }
 0x10c   :  { %v115_v58 = vmul.f32 0.5, %v114_v56 }
 0x10d   :  { %v136_v59 = vsub.f32 1.5, %v135_v57 }
 0x10e   :  { %v272_v60 = vpop.eup %271  ;;  %v116_v61 = vsub.f32 1.5, %v115_v58 }
 0x10f   :  { %v274_v62 = vpop.eup %273  ;;  %v137_v63 = vmul.f32 %v268_v49, %v136_v59  ;;  %v143_v0 = vmul.f32 %v272_v60, %v111_v50  ;;  %vm149_vm8 = vweird.f32 %v272_v60 }
 0x110   :  { %v117_v2 = vmul.f32 %v270_v52, %v116_v61  ;;  %v123_v3 = vmul.f32 %v274_v62, %v109_v51  ;;  %vm129_vm10 = vweird.f32 %v274_v62  ;;  %vm150_vm12 = vmor %vm148_vm11, %vm149_vm8 }
 0x111   :  { %v141_v4 = vsel %vm140_vm6, %v268_v49, %v137_v63  ;;  %v144_v5 = vmul.f32 %v272_v60, %v143_v0  ;;  %vm130_vm13 = vmor %vm128_vm9, %vm129_vm10 }
 0x112   :  { %v154_v7 = vmul.f32 %v141_v4, %v372_v19  ;;  %v121_v8 = vsel %vm120_vm7, %v270_v52, %v117_v2  ;;  %v124_v9 = vmul.f32 %v274_v62, %v123_v3 }
 0x113   :  { %v152_v10 = vmul.f32 %v121_v8, %v374_v20  ;;  %v145_v11 = vmul.f32 0.5, %v144_v5 }
 0x114   :  { %v162_v12 = vmul.f32 %v262_v1, %v154_v7  ;;  %v125_v13 = vmul.f32 0.5, %v124_v9 }
 0x115   :  { %v160_v14 = vmul.f32 %v262_v1, %v152_v10  ;;  %v146_v15 = vsub.f32 1.5, %v145_v11 }
 0x116   :  { %v170_v16 = vadd.f32 %v263_v6, %v162_v12  ;;  %v126_v17 = vsub.f32 1.5, %v125_v13 }
 0x117   :  { %v168_v18 = vadd.f32 %v263_v6, %v160_v14  ;;  %v147_v21 = vmul.f32 %v272_v60, %v146_v15 }
 0x118   :  { %174 = vst.msk [vmem:[#allocation2 + $0x10] sm:$0xff] %vm60_vm0, %v170_v16  ;;  %v127_v19 = vmul.f32 %v274_v62, %v126_v17 }
 0x119   :  { %172 = vst.msk [vmem:[#allocation2] sm:$0xff] %vm60_vm0, %v168_v18  ;;  %v151_v20 = vsel %vm150_vm12, %v272_v60, %v147_v21 }
 0x11a   :  { %v155_v22 = vmul.f32 %v151_v20, %v382_v29  ;;  %v131_v23 = vsel %vm130_vm13, %v274_v62, %v127_v19  ;;  %v264_v29 = vld [vmem:[%s429_s4] ss:$0 sm:$0xff] }
 0x11b   :  { %v153_v24 = vmul.f32 %v131_v23, %v384_v30 }
 0x11c   :  { %v163_v25 = vmul.f32 %v262_v1, %v155_v22 }
 0x11d   :  { %v161_v26 = vmul.f32 %v262_v1, %v153_v24 }
 0x11e   :  { %v171_v27 = vadd.f32 %v263_v6, %v163_v25 }
 0x11f   :  { %v169_v28 = vadd.f32 %v263_v6, %v161_v26  ;;  %v178_v31 = vld [vmem:[#allocation2 + $0x10] sm:$0xff] }
 0x120   :  { %175 = vst.msk [vmem:[#allocation2 + $0x18] sm:$0xff] %vm60_vm0, %v171_v27  ;;  %v176_v32 = vld [vmem:[#allocation2] sm:$0xff]  ;;  %243 = vmatmul.msk.f32.vlgmr.msra.gmra.mxu2 %vm60_vm0, %v178_v31 }
 0x121   :  { %173 = vst.msk [vmem:[#allocation2 + $0x8] sm:$0xff] %vm60_vm0, %v169_v28  ;;  %241 = vmatmul.msk.f32.vlgmr.msra.gmra.mxu0 %vm60_vm0, %v176_v32 }
 0x127   :  { %v179_v33 = vld [vmem:[#allocation2 + $0x18] sm:$0xff] }
 0x128   :  { %v177_v34 = vld [vmem:[#allocation2 + $0x8] sm:$0xff]  ;;  %244 = vmatmul.msk.f32.vlgmr.msra.gmra.mxu3 %vm60_vm0, %v179_v33 }
 0x129   :  { %242 = vmatmul.msk.f32.vlgmr.msra.gmra.mxu1 %vm60_vm0, %v177_v34 }
 0x19e   :  { %v218_v30 = vpop.f32.mrf.mxu0 }
 0x19f   :  { %v219_v35 = vadd.f32 %v264_v29, %v218_v30 }
 0x1a1   :  { %231 = vst.msk [vmem:[%s430_s5] sm:$0xff] %vm230_vm14, %v219_v35 }
 0x1a3   :  { %v224_v36 = vpop.f32.mrf.mxu2 }
 0x1a4   :  { %v225_v37 = vadd.f32 %v264_v29, %v224_v36 }
 0x1a6   :  { %233 = vst.msk [vmem:[%s430_s5 + $0x10] sm:$0xff] %vm230_vm14, %v225_v37  ;;  %v221_v38 = vpop.f32.mrf.mxu1 }
 0x1a7   :  { %v222_v39 = vadd.f32 %v264_v29, %v221_v38 }
 0x1a9   :  { %232 = vst.msk [vmem:[%s430_s5 + $0x8] sm:$0xff] %vm230_vm14, %v222_v39 }
 0x1ab   :  { %v227_v40 = vpop.f32.mrf.mxu3 }
 0x1ac   :  { %v228_v41 = vadd.f32 %v264_v29, %v227_v40 }
 0x1ae   :  { %234 = vst.msk [vmem:[%s430_s5 + $0x18] sm:$0xff] %vm230_vm14, %v228_v41 }
 0x1af   :  { %239 = vsyncpa [#allocation4], 1 }
 0x1b0   :  { %240 = vsyncpa [#allocation6], 1 }

// kernel: block_forward.6
= control target key start
LH: loop header
LB: loop body
LE: loop exit
PB: predicated region body
PF: predicated region fallthrough
CT: control target
= control target key end

     0   :  { %vm43_vm0 = vcmask 261120   ;;  %v344_v29 = vmov 32.0   ;;  %s519_s1 = inlined_call_operand.vmem [shape: f32[32,32], index: 1, kind: input, shape index: {}]   ;;  %s520_s2 = inlined_call_operand.vmem [shape: f32[1,32], index: 2, kind: input, shape index: {}]   ;;  %s521_s0 = inlined_call_operand.vmem [shape: f32[32,32], index: 0, kind: input, shape index: {}]   ;;  %s522_s3 = inlined_call_operand.vmem [shape: f32[32,32], index: 3, kind: input, shape index: {}]   ;;  %s523_s8 = inlined_call_operand.vmem [shape: f32[32,32], index: 8, kind: output, shape index: {0}]   ;;  %s524_s4 = inlined_call_operand.vmem [shape: f32[1,32], index: 4, kind: input, shape index: {}]   ;;  %s525_s5 = inlined_call_operand.vmem [shape: f32[1,32], index: 5, kind: input, shape index: {}]   ;;  %s526_s7 = inlined_call_operand.vmem [shape: f32[1,128], index: 7, kind: input, shape index: {}]   ;;  %s527_s6 = inlined_call_operand.vmem [shape: f32[32,128], index: 6, kind: input, shape index: {}]   ;;  %s528_s9 = inlined_call_operand.vmem [shape: f32[32,128], index: 9, kind: output, shape index: {1}]  }
   0x1   :  { %v38_v0 = vld [vmem:[%s519_s1 + $0x18] sm:$0xff]  ;;  %v37_v1 = vld [vmem:[%s519_s1 + $0x10] sm:$0xff]  ;;  %v36_v2 = vld [vmem:[%s519_s1 + $0x8] sm:$0xff]  ;;  %326 = vrcp.f32 %v344_v29 }
   0x2   :  { %313 = vmatpush.msra.mxu2 %v38_v0  ;;  %68 = vmatpush.msra.mxu0 %v38_v0  ;;  %v35_v3 = vld [vmem:[%s519_s1] sm:$0xff]  ;;  %v33_v4 = vld [vmem:[%s521_s0 + $0x10] sm:$0xff]  ;;  %v34_v6 = vld [vmem:[%s521_s0 + $0x18] sm:$0xff] }
   0x3   :  { %v31_v5 = vld [vmem:[%s521_s0] sm:$0xff]  ;;  %v32_v7 = vld [vmem:[%s521_s0 + $0x8] sm:$0xff]  ;;  %v87_v14 = vld [vmem:[%s522_s3 + $0x10] sm:$0xff] }
   0x4   :  { %314 = vmatpush.msra.mxu2 %v37_v1  ;;  %69 = vmatpush.msra.mxu0 %v37_v1  ;;  %v322_v8 = vld [vmem:[%s520_s2] ss:$0 sm:$0xff]  ;;  %v86_v17 = vld [vmem:[%s522_s3 + $0x8] sm:$0xff]  ;;  %v88_v23 = vld [vmem:[%s522_s3 + $0x18] sm:$0xff] }
   0x5   :  { %v85_v10 = vld [vmem:[%s522_s3] sm:$0xff]  ;;  %v211_v56 = vld [vmem:[%s527_s6 + $0x18] sm:$0xff]  ;;  %v210_v57 = vld [vmem:[%s527_s6 + $0x10] sm:$0xff] }
   0x6   :  { %315 = vmatpush.msra.mxu2 %v36_v2  ;;  %70 = vmatpush.msra.mxu0 %v36_v2  ;;  %v209_v58 = vld [vmem:[%s527_s6 + $0x8] sm:$0xff]  ;;  %v208_v59 = vld [vmem:[%s527_s6] sm:$0xff] }
   0x7   :  { %v327_v30 = vpop.eup %326  ;;  %317 = vmatpush.msra.mxu3 %v211_v56  ;;  %240 = vmatpush.msra.mxu1 %v211_v56 }
   0x8   :  { %316 = vmatpush.msra.mxu2 %v35_v3  ;;  %71 = vmatpush.msra.mxu0 %v35_v3  ;;  %v110_v31 = vmul.f32 32.0, %v327_v30  ;;  %vm114_vm1 = vweird.f32 %v327_v30 }
   0x9   :  { %307 = vmatmul.msk.f32.vlgmr.msra.gmra.mxu2 %vm43_vm0, %v33_v4  ;;  %305 = vmatmul.msk.f32.vlgmr.msra.gmra.mxu0 %vm43_vm0, %v31_v5 }
   0xa   :  { %v111_v32 = vsub.f32 1.0, %v110_v31  ;;  %318 = vmatpush.msra.mxu3 %v210_v57  ;;  %241 = vmatpush.msra.mxu1 %v210_v57 }
   0xc   :  { %v112_v33 = vmul.f32 %v327_v30, %v111_v32  ;;  %319 = vmatpush.msra.mxu3 %v209_v58  ;;  %242 = vmatpush.msra.mxu1 %v209_v58 }
   0xe   :  { %v113_v34 = vadd.f32 %v327_v30, %v112_v33  ;;  %320 = vmatpush.msra.mxu3 %v208_v59  ;;  %243 = vmatpush.msra.mxu1 %v208_v59 }
  0x10   :  { %v115_v35 = vsel %vm114_vm1, %v327_v30, %v113_v34 }
  0x11   :  { %308 = vmatmul.msk.f32.gmra.mxu2 %vm43_vm0, %v34_v6  ;;  %306 = vmatmul.msk.f32.gmra.mxu0 %vm43_vm0, %v32_v7 }
  0x86   :  { %v73_v9 = vpop.f32.mrf.mxu0 }
  0x87   :  { %v74_v11 = vadd.f32 %v322_v8, %v73_v9 }
  0x89   :  { %v89_v12 = vadd.f32 %v85_v10, %v74_v11 }
  0x8b   :  { %93 = vst.msk [vmem:[%s523_s8] sm:$0xff] %vm43_vm0, %v89_v12  ;;  %v97_v26 = vsel %vm43_vm0, %v89_v12, 0.0 }
  0x8c   :  { %v79_v13 = vpop.f32.mrf.mxu2 }
  0x8d   :  { %v80_v15 = vadd.f32 %v322_v8, %v79_v13 }
  0x8e   :  { %v76_v16 = vpop.f32.mrf.mxu0 }
  0x8f   :  { %v91_v18 = vadd.f32 %v87_v14, %v80_v15  ;;  %v77_v19 = vadd.f32 %v322_v8, %v76_v16 }
  0x91   :  { %95 = vst.msk [vmem:[%s523_s8 + $0x10] sm:$0xff] %vm43_vm0, %v91_v18  ;;  %v103_v20 = vsel %vm43_vm0, %v91_v18, 0.0  ;;  %v90_v21 = vadd.f32 %v86_v17, %v77_v19 }
  0x92   :  { %104 = vadd.xlane.f32.xlu0 %v103_v20 }
  0x93   :  { %94 = vst.msk [vmem:[%s523_s8 + $0x8] sm:$0xff] %vm43_vm0, %v90_v21  ;;  %v100_v28 = vsel %vm43_vm0, %v90_v21, 0.0 }
  0x94   :  { %v82_v22 = vpop.f32.mrf.mxu2 }
  0x95   :  { %v83_v24 = vadd.f32 %v322_v8, %v82_v22 }
  0x97   :  { %v92_v25 = vadd.f32 %v88_v23, %v83_v24  ;;  %v324_v23 = vld [vmem:[%s525_s5] ss:$0 sm:$0xff] }
  0x99   :  { %96 = vst.msk [vmem:[%s523_s8 + $0x18] sm:$0xff] %vm43_vm0, %v92_v25  ;;  %v106_v27 = vsel %vm43_vm0, %v92_v25, 0.0 }
  0x9a   :  { %107 = vadd.xlane.f32.xlu1 %v106_v27  ;;  %98 = vadd.xlane.f32.xlu0 %v97_v26 }
  0xa2   :  { %101 = vadd.xlane.f32.xlu1 %v100_v28 }
 0x105   :  { %v105_v36 = vpop.xlane.xlu0 %104 }
 0x106   :  { %v118_v37 = vmul.f32 %v115_v35, %v105_v36 }
 0x108   :  { %v458_v38 = vsub.f32 %v91_v18, %v118_v37  ;;  %v323_v18 = vld [vmem:[%s524_s4] ss:$0 sm:$0xff] }
 0x10a   :  { %v126_v39 = vmul.f32 %v458_v38, %v458_v38 }
 0x10c   :  { %v134_v40 = vsel %vm43_vm0, %v126_v39, 0.0 }
 0x10d   :  { %v108_v41 = vpop.xlane.xlu1 %107  ;;  %135 = vadd.xlane.f32.xlu2 %v134_v40  ;;  %v99_v42 = vpop.xlane.xlu0 %98 }
 0x10e   :  { %v119_v43 = vmul.f32 %v115_v35, %v108_v41  ;;  %v116_v44 = vmul.f32 %v115_v35, %v99_v42 }
 0x110   :  { %v463_v45 = vsub.f32 %v92_v25, %v119_v43  ;;  %v465_v46 = vsub.f32 %v89_v12, %v116_v44 }
 0x112   :  { %v127_v47 = vmul.f32 %v463_v45, %v463_v45  ;;  %v124_v48 = vmul.f32 %v465_v46, %v465_v46 }
 0x114   :  { %v137_v49 = vsel %vm43_vm0, %v127_v47, 0.0  ;;  %v128_v50 = vsel %vm43_vm0, %v124_v48, 0.0 }
 0x115   :  { %v102_v51 = vpop.xlane.xlu1 %101  ;;  %138 = vadd.xlane.f32.xlu0 %v137_v49  ;;  %129 = vadd.xlane.f32.xlu2 %v128_v50 }
 0x116   :  { %v117_v52 = vmul.f32 %v115_v35, %v102_v51 }
 0x118   :  { %v473_v53 = vsub.f32 %v90_v21, %v117_v52 }
 0x11a   :  { %v125_v54 = vmul.f32 %v473_v53, %v473_v53 }
 0x11c   :  { %v131_v55 = vsel %vm43_vm0, %v125_v54, 0.0 }
 0x11d   :  { %132 = vadd.xlane.f32.xlu1 %v131_v55 }
 0x180   :  { %v136_v60 = vpop.xlane.xlu2 %135 }
 0x181   :  { %v142_v61 = vmul.f32 %v136_v60, %v115_v35 }
 0x183   :  { %v146_v62 = vadd.f32 1e-06, %v142_v61 }
 0x185   :  { %328 = vrsqrt.f32 %v146_v62  ;;  %vm174_vm3 = vweird.f32 %v146_v62 }
 0x188   :  { %v130_v63 = vpop.xlane.xlu2 %129  ;;  %v139_v0 = vpop.xlane.xlu0 %138 }
 0x189   :  { %v140_v1 = vmul.f32 %v130_v63, %v115_v35  ;;  %v143_v2 = vmul.f32 %v139_v0, %v115_v35 }
 0x18b   :  { %v329_v3 = vpop.eup %328  ;;  %v144_v4 = vadd.f32 1e-06, %v140_v1  ;;  %v147_v5 = vadd.f32 1e-06, %v143_v2 }
 0x18c   :  { %v169_v6 = vmul.f32 %v329_v3, %v146_v62  ;;  %vm175_vm2 = vweird.f32 %v329_v3 }
 0x18d   :  { %330 = vrsqrt.f32 %v144_v4  ;;  %vm176_vm4 = vmor %vm174_vm3, %vm175_vm2  ;;  %vm154_vm7 = vweird.f32 %v144_v4  ;;  %vm184_vm9 = vweird.f32 %v147_v5 }
 0x18e   :  { %v170_v7 = vmul.f32 %v329_v3, %v169_v6  ;;  %332 = vrsqrt.f32 %v147_v5 }
 0x190   :  { %v171_v8 = vmul.f32 0.5, %v170_v7  ;;  %v133_v9 = vpop.xlane.xlu1 %132 }
 0x191   :  { %v141_v10 = vmul.f32 %v133_v9, %v115_v35 }
 0x192   :  { %v172_v11 = vsub.f32 1.5, %v171_v8 }
 0x193   :  { %v331_v12 = vpop.eup %330  ;;  %v145_v13 = vadd.f32 1e-06, %v141_v10 }
 0x194   :  { %v333_v14 = vpop.eup %332  ;;  %v173_v15 = vmul.f32 %v329_v3, %v172_v11  ;;  %v149_v16 = vmul.f32 %v331_v12, %v144_v4  ;;  %vm155_vm5 = vweird.f32 %v331_v12 }
 0x195   :  { %v179_v17 = vmul.f32 %v333_v14, %v147_v5  ;;  %334 = vrsqrt.f32 %v145_v13  ;;  %vm185_vm6 = vweird.f32 %v333_v14  ;;  %vm156_vm8 = vmor %vm154_vm7, %vm155_vm5  ;;  %vm164_vm12 = vweird.f32 %v145_v13 }
 0x196   :  { %v177_v19 = vsel %vm176_vm4, %v329_v3, %v173_v15  ;;  %v150_v20 = vmul.f32 %v331_v12, %v149_v16  ;;  %vm186_vm10 = vmor %vm184_vm9, %vm185_vm6 }
 0x197   :  { %v180_v21 = vmul.f32 %v333_v14, %v179_v17  ;;  %v190_v22 = vmul.f32 %v177_v19, %v458_v38 }
 0x198   :  { %v151_v24 = vmul.f32 0.5, %v150_v20 }
 0x199   :  { %v181_v25 = vmul.f32 0.5, %v180_v21  ;;  %v198_v26 = vmul.f32 %v323_v18, %v190_v22 }
 0x19a   :  { %v152_v27 = vsub.f32 1.5, %v151_v24 }
 0x19b   :  { %v335_v28 = vpop.eup %334  ;;  %v182_v29 = vsub.f32 1.5, %v181_v25  ;;  %v206_v30 = vadd.f32 %v324_v23, %v198_v26 }
 0x19c   :  { %v153_v31 = vmul.f32 %v331_v12, %v152_v27  ;;  %v159_v32 = vmul.f32 %v335_v28, %v145_v13  ;;  %vm165_vm11 = vweird.f32 %v335_v28 }
 0x19d   :  { %v183_v33 = vmul.f32 %v333_v14, %v182_v29  ;;  %311 = vmatmul.msk.f32.vlgmr.msra.gmra.mxu3 %vm43_vm0, %v206_v30  ;;  %vm166_vm13 = vmor %vm164_vm12, %vm165_vm11 }
 0x19e   :  { %v157_v34 = vsel %vm156_vm8, %v331_v12, %v153_v31  ;;  %v160_v35 = vmul.f32 %v335_v28, %v159_v32 }
 0x19f   :  { %v187_v36 = vsel %vm186_vm10, %v333_v14, %v183_v33  ;;  %v188_v37 = vmul.f32 %v157_v34, %v465_v46 }
 0x1a0   :  { %v161_v38 = vmul.f32 0.5, %v160_v35  ;;  %v191_v39 = vmul.f32 %v187_v36, %v463_v45  ;;  %v325_v45 = vld [vmem:[%s526_s7] ss:$0 sm:$0xff] }
 0x1a1   :  { %v196_v40 = vmul.f32 %v323_v18, %v188_v37 }
 0x1a2   :  { %v162_v41 = vsub.f32 1.5, %v161_v38  ;;  %v199_v42 = vmul.f32 %v323_v18, %v191_v39 }
 0x1a3   :  { %v204_v43 = vadd.f32 %v324_v23, %v196_v40 }
 0x1a4   :  { %v163_v44 = vmul.f32 %v335_v28, %v162_v41  ;;  %v207_v47 = vadd.f32 %v324_v23, %v199_v42 }
 0x1a5   :  { %309 = vmatmul.msk.f32.vlgmr.msra.gmra.mxu1 %vm43_vm0, %v204_v43 }
 0x1a6   :  { %v167_v48 = vsel %vm166_vm13, %v335_v28, %v163_v44  ;;  %312 = vmatmul.msk.f32.gmra.mxu3 %vm43_vm0, %v207_v47 }
 0x1a7   :  { %v189_v49 = vmul.f32 %v167_v48, %v473_v53 }
 0x1a9   :  { %v197_v46 = vmul.f32 %v323_v18, %v189_v49 }
 0x1ab   :  { %v205_v50 = vadd.f32 %v324_v23, %v197_v46 }
 0x1ad   :  { %310 = vmatmul.msk.f32.gmra.mxu1 %vm43_vm0, %v205_v50 }
 0x220   :  { %v251_v51 = vpop.f32.mrf.mxu3 }
 0x221   :  { %v252_v52 = vadd.f32 %v325_v45, %v251_v51 }
 0x222   :  { %v245_v54 = vpop.f32.mrf.mxu1 }
 0x223   :  { %v259_v55 = vmul.f32 %v252_v52, %v252_v52  ;;  %v246_v56 = vadd.f32 %v325_v45, %v245_v54 }
 0x225   :  { %v263_v57 = vmul.f32 %v259_v55, %v252_v52  ;;  %v257_v58 = vmul.f32 %v246_v56, %v246_v56 }
 0x227   :  { %v267_v59 = vmul.f32 0.044715, %v263_v57  ;;  %v261_v60 = vmul.f32 %v257_v58, %v246_v56 }
 0x229   :  { %v271_v61 = vadd.f32 %v267_v59, %v252_v52  ;;  %v265_v62 = vmul.f32 0.044715, %v261_v60  ;;  %v254_v53 = vpop.f32.mrf.mxu3 }
 0x22a   :  { %v255_v63 = vadd.f32 %v325_v45, %v254_v53  ;;  %v248_v0 = vpop.f32.mrf.mxu1 }
 0x22b   :  { %v275_v1 = vmul.f32 0.7978846, %v271_v61  ;;  %v269_v2 = vadd.f32 %v265_v62, %v246_v56  ;;  %v249_v3 = vadd.f32 %v325_v45, %v248_v0 }
 0x22c   :  { %v260_v4 = vmul.f32 %v255_v63, %v255_v63 }
 0x22d   :  { %336 = vtanh.f32 %v275_v1  ;;  %v273_v5 = vmul.f32 0.7978846, %v269_v2  ;;  %v258_v6 = vmul.f32 %v249_v3, %v249_v3 }
 0x22e   :  { %v264_v7 = vmul.f32 %v260_v4, %v255_v63 }
 0x22f   :  { %338 = vtanh.f32 %v273_v5  ;;  %v262_v8 = vmul.f32 %v258_v6, %v249_v3 }
 0x230   :  { %v268_v9 = vmul.f32 0.044715, %v264_v7 }
 0x231   :  { %v266_v10 = vmul.f32 0.044715, %v262_v8 }
 0x232   :  { %v272_v11 = vadd.f32 %v268_v9, %v255_v63 }
 0x233   :  { %v337_v12 = vpop.eup %336  ;;  %v270_v13 = vadd.f32 %v266_v10, %v249_v3 }
 0x234   :  { %v283_v14 = vadd.f32 1.0, %v337_v12  ;;  %v276_v15 = vmul.f32 0.7978846, %v272_v11 }
 0x235   :  { %v339_v16 = vpop.eup %338  ;;  %v274_v17 = vmul.f32 0.7978846, %v270_v13 }
 0x236   :  { %v287_v18 = vmul.f32 0.5, %v283_v14  ;;  %v281_v19 = vadd.f32 1.0, %v339_v16  ;;  %340 = vtanh.f32 %v276_v15 }
 0x237   :  { %342 = vtanh.f32 %v274_v17 }
 0x238   :  { %v291_v20 = vmul.f32 %v287_v18, %v252_v52  ;;  %v285_v21 = vmul.f32 0.5, %v281_v19 }
 0x23a   :  { %295 = vst [vmem:[%s528_s9 + $0x10] sm:$0xff] %v291_v20  ;;  %v289_v22 = vmul.f32 %v285_v21, %v246_v56 }
 0x23c   :  { %v341_v23 = vpop.eup %340  ;;  %293 = vst [vmem:[%s528_s9] sm:$0xff] %v289_v22 }
 0x23d   :  { %v343_v24 = vpop.eup %342  ;;  %v284_v25 = vadd.f32 1.0, %v341_v23 }
 0x23e   :  { %v282_v26 = vadd.f32 1.0, %v343_v24 }
 0x23f   :  { %v288_v27 = vmul.f32 0.5, %v284_v25 }
 0x240   :  { %v286_v28 = vmul.f32 0.5, %v282_v26 }
 0x241   :  { %v292_v29 = vmul.f32 %v288_v27, %v255_v63 }
 0x242   :  { %v290_v30 = vmul.f32 %v286_v28, %v249_v3 }
 0x243   :  { %296 = vst [vmem:[%s528_s9 + $0x18] sm:$0xff] %v292_v29 }
 0x244   :  { %294 = vst [vmem:[%s528_s9 + $0x8] sm:$0xff] %v290_v30 }

// kernel: block_forward.7
= control target key start
LH: loop header
LB: loop body
LE: loop exit
PB: predicated region body
PF: predicated region fallthrough
CT: control target
= control target key end

     0   :  { %vm22_vm0 = vcmask 261120   ;;  %v213_v3 = vmov 0.0   ;;  %s332_s0 = inlined_call_operand.vmem [shape: f32[32,128], index: 0, kind: input, shape index: {}]   ;;  %s333_s1 = inlined_call_operand.vmem [shape: f32[128,32], index: 1, kind: input, shape index: {}]   ;;  %s334_s2 = inlined_call_operand.vmem [shape: f32[1,32], index: 2, kind: input, shape index: {}]   ;;  %s335_s3 = inlined_call_operand.vmem [shape: f32[32,32], index: 3, kind: input, shape index: {}]   ;;  %s336_s4 = inlined_call_operand.hbm [shape: f32[32,32], index: 4, kind: output, shape index: {}]  }
   0x1   :  { %v50_v0 = vld [vmem:[%s333_s1 + $0x78] sm:$0xff]  ;;  %v49_v1 = vld [vmem:[%s333_s1 + $0x70] sm:$0xff]  ;;  %v48_v2 = vld [vmem:[%s333_s1 + $0x68] sm:$0xff]  ;;  %23 = vst.msk [vmem:[#allocation2] sm:$0xff] %vm22_vm0, %v213_v3 }
   0x2   :  { %135 = vmatpush.msra.mxu2 %v50_v0  ;;  %136 = vmatpush.msra.mxu3 %v50_v0  ;;  %v47_v4 = vld [vmem:[%s333_s1 + $0x60] sm:$0xff]  ;;  %24 = vst.msk [vmem:[#allocation2 + $0x8] sm:$0xff] %vm22_vm0, %v213_v3  ;;  %v46_v5 = vld [vmem:[%s333_s1 + $0x58] sm:$0xff] }
   0x3   :  { %51 = vmatpush.msra.mxu0 %v50_v0  ;;  %134 = vmatpush.msra.mxu1 %v50_v0  ;;  %25 = vst.msk [vmem:[#allocation2 + $0x10] sm:$0xff] %vm22_vm0, %v213_v3 }
   0x4   :  { %138 = vmatpush.msra.mxu2 %v49_v1  ;;  %139 = vmatpush.msra.mxu3 %v49_v1  ;;  %26 = vst.msk [vmem:[#allocation2 + $0x18] sm:$0xff] %vm22_vm0, %v213_v3 }
   0x5   :  { %52 = vmatpush.msra.mxu0 %v49_v1  ;;  %137 = vmatpush.msra.mxu1 %v49_v1 }
   0x6   :  { %141 = vmatpush.msra.mxu2 %v48_v2  ;;  %142 = vmatpush.msra.mxu3 %v48_v2 }
   0x7   :  { %53 = vmatpush.msra.mxu0 %v48_v2  ;;  %140 = vmatpush.msra.mxu1 %v48_v2 }
   0x8   :  { %9 = vsyncpa [#allocation4], 0  ;;  %144 = vmatpush.msra.mxu2 %v47_v4  ;;  %145 = vmatpush.msra.mxu3 %v47_v4  ;;  %v45_v6 = vld [vmem:[%s333_s1 + $0x50] sm:$0xff]  ;;  %v44_v7 = vld [vmem:[%s333_s1 + $0x48] sm:$0xff]  ;;  %s122_s12 = sshll.u32 %s336_s4, 4  ;;  %s215_s4 = smov 128   ;;  %s123_s12 = int_to_ptr.hbm [resolvable:$true] %s122_s12 }
   0x9   :  { %54 = vmatpush.msra.mxu0 %v47_v4  ;;  %143 = vmatpush.msra.mxu1 %v47_v4  ;;  %v43_v8 = vld [vmem:[%s333_s1 + $0x40] sm:$0xff]  ;;  %v42_v9 = vld [vmem:[%s333_s1 + $0x38] sm:$0xff]  ;;  %v41_v10 = vld [vmem:[%s333_s1 + $0x30] sm:$0xff]  ;;  %s216_s15 = smov 8  }
   0xa   :  { %147 = vmatpush.msra.mxu2 %v46_v5  ;;  %148 = vmatpush.msra.mxu3 %v46_v5  ;;  %v40_v11 = vld [vmem:[%s333_s1 + $0x28] sm:$0xff]  ;;  %v39_v12 = vld [vmem:[%s333_s1 + $0x20] sm:$0xff]  ;;  %v38_v13 = vld [vmem:[%s333_s1 + $0x18] sm:$0xff] }
   0xb   :  { %55 = vmatpush.msra.mxu0 %v46_v5  ;;  %146 = vmatpush.msra.mxu1 %v46_v5  ;;  %v37_v14 = vld [vmem:[%s333_s1 + $0x10] sm:$0xff]  ;;  %v36_v15 = vld [vmem:[%s333_s1 + $0x8] sm:$0xff]  ;;  %v35_v16 = vld [vmem:[%s333_s1] sm:$0xff] }
   0xc   :  { %150 = vmatpush.msra.mxu2 %v45_v6  ;;  %151 = vmatpush.msra.mxu3 %v45_v6  ;;  %v33_v17 = vld [vmem:[%s332_s0 + $0x10] sm:$0xff]  ;;  %v34_v18 = vld [vmem:[%s332_s0 + $0x18] sm:$0xff]  ;;  %v31_v19 = vld [vmem:[%s332_s0] sm:$0xff] }
   0xd   :  { %56 = vmatpush.msra.mxu0 %v45_v6  ;;  %149 = vmatpush.msra.mxu1 %v45_v6  ;;  %v32_v20 = vld [vmem:[%s332_s0 + $0x8] sm:$0xff]  ;;  %v27_v21 = vld [vmem:[#allocation2] sm:$0xff]  ;;  %v29_v27 = vld [vmem:[#allocation2 + $0x10] sm:$0xff] }
   0xe   :  { %153 = vmatpush.msra.mxu2 %v44_v7  ;;  %154 = vmatpush.msra.mxu3 %v44_v7  ;;  %v28_v22 = vld [vmem:[#allocation2 + $0x8] sm:$0xff]  ;;  %v30_v28 = vld [vmem:[#allocation2 + $0x18] sm:$0xff]  ;;  %v186_v33 = vld [vmem:[%s334_s2] ss:$0 sm:$0xff]  ;;  %s214_s2 = smov [#allocation3]  }
   0xf   :  { %57 = vmatpush.msra.mxu0 %v44_v7  ;;  %152 = vmatpush.msra.mxu1 %v44_v7  ;;  %v104_v35 = vld [vmem:[%s335_s3] sm:$0xff]  ;;  %v105_v38 = vld [vmem:[%s335_s3 + $0x8] sm:$0xff]  ;;  %v106_v42 = vld [vmem:[%s335_s3 + $0x10] sm:$0xff]  ;;  %s120_s9 = sshll.u32 %s214_s2, 4  ;;  %s121_s9 = int_to_ptr.vmem [resolvable:$true] %s120_s9 }
  0x10   :  { %156 = vmatpush.msra.mxu2 %v43_v8  ;;  %157 = vmatpush.msra.mxu3 %v43_v8  ;;  %v107_v46 = vld [vmem:[%s335_s3 + $0x18] sm:$0xff] }
  0x11   :  { %58 = vmatpush.msra.mxu0 %v43_v8  ;;  %155 = vmatpush.msra.mxu1 %v43_v8 }
  0x12   :  { %159 = vmatpush.msra.mxu2 %v42_v9  ;;  %160 = vmatpush.msra.mxu3 %v42_v9 }
  0x13   :  { %59 = vmatpush.msra.mxu0 %v42_v9  ;;  %158 = vmatpush.msra.mxu1 %v42_v9 }
  0x14   :  { %162 = vmatpush.msra.mxu2 %v41_v10  ;;  %163 = vmatpush.msra.mxu3 %v41_v10 }
  0x15   :  { %60 = vmatpush.msra.mxu0 %v41_v10  ;;  %161 = vmatpush.msra.mxu1 %v41_v10 }
  0x16   :  { %165 = vmatpush.msra.mxu2 %v40_v11  ;;  %166 = vmatpush.msra.mxu3 %v40_v11 }
  0x17   :  { %61 = vmatpush.msra.mxu0 %v40_v11  ;;  %164 = vmatpush.msra.mxu1 %v40_v11 }
  0x18   :  { %168 = vmatpush.msra.mxu2 %v39_v12  ;;  %169 = vmatpush.msra.mxu3 %v39_v12 }
  0x19   :  { %62 = vmatpush.msra.mxu0 %v39_v12  ;;  %167 = vmatpush.msra.mxu1 %v39_v12 }
  0x1a   :  { %171 = vmatpush.msra.mxu2 %v38_v13  ;;  %172 = vmatpush.msra.mxu3 %v38_v13 }
  0x1b   :  { %63 = vmatpush.msra.mxu0 %v38_v13  ;;  %170 = vmatpush.msra.mxu1 %v38_v13 }
  0x1c   :  { %174 = vmatpush.msra.mxu2 %v37_v14  ;;  %175 = vmatpush.msra.mxu3 %v37_v14 }
  0x1d   :  { %64 = vmatpush.msra.mxu0 %v37_v14  ;;  %173 = vmatpush.msra.mxu1 %v37_v14 }
  0x1e   :  { %177 = vmatpush.msra.mxu2 %v36_v15  ;;  %178 = vmatpush.msra.mxu3 %v36_v15 }
  0x1f   :  { %65 = vmatpush.msra.mxu0 %v36_v15  ;;  %176 = vmatpush.msra.mxu1 %v36_v15 }
  0x20   :  { %180 = vmatpush.msra.mxu2 %v35_v16  ;;  %181 = vmatpush.msra.mxu3 %v35_v16 }
  0x21   :  { %73 = vmatmul.f32.vlgmr.msra.gmra.mxu2 %v33_v17  ;;  %76 = vmatmul.f32.vlgmr.msra.gmra.mxu3 %v34_v18 }
  0x22   :  { %66 = vmatpush.msra.mxu0 %v35_v16  ;;  %179 = vmatpush.msra.mxu1 %v35_v16 }
  0x23   :  { %67 = vmatmul.f32.vlgmr.msra.gmra.mxu0 %v31_v19  ;;  %70 = vmatmul.f32.vlgmr.msra.gmra.mxu1 %v32_v20 }
  0xa0   :  { %v68_v23 = vpop.f32.mrf.mxu0  ;;  %v71_v24 = vpop.f32.mrf.mxu1 }
  0xa1   :  { %v80_v25 = vadd.f32 %v68_v23, %v27_v21  ;;  %v81_v26 = vadd.f32 %v71_v24, %v28_v22 }
  0xa3   :  { %85 = vst.msk [vmem:[#allocation2] sm:$0xff] %vm22_vm0, %v80_v25 }
  0xa4   :  { %86 = vst.msk [vmem:[#allocation2 + $0x8] sm:$0xff] %vm22_vm0, %v81_v26  ;;  %v74_v29 = vpop.f32.mrf.mxu2  ;;  %v77_v30 = vpop.f32.mrf.mxu3 }
  0xa5   :  { %v82_v31 = vadd.f32 %v74_v29, %v29_v27  ;;  %v83_v32 = vadd.f32 %v77_v30, %v30_v28 }
  0xa7   :  { %87 = vst.msk [vmem:[#allocation2 + $0x10] sm:$0xff] %vm22_vm0, %v82_v31 }
  0xa8   :  { %88 = vst.msk [vmem:[#allocation2 + $0x18] sm:$0xff] %vm22_vm0, %v83_v32 }
  0xaa   :  { %v92_v34 = vld [vmem:[#allocation2] sm:$0xff] }
  0xab   :  { %v93_v36 = vld [vmem:[#allocation2 + $0x8] sm:$0xff]  ;;  %v100_v37 = vadd.f32 %v186_v33, %v92_v34 }
  0xac   :  { %v101_v39 = vadd.f32 %v186_v33, %v93_v36 }
  0xad   :  { %v108_v40 = vadd.f32 %v104_v35, %v100_v37 }
  0xae   :  { %v94_v41 = vld [vmem:[#allocation2 + $0x10] sm:$0xff]  ;;  %v109_v43 = vadd.f32 %v105_v38, %v101_v39 }
  0xaf   :  { %v95_v44 = vld [vmem:[#allocation2 + $0x18] sm:$0xff]  ;;  %v102_v45 = vadd.f32 %v186_v33, %v94_v41  ;;  %112 = vst.msk [vmem:[#allocation3] sm:$0xff] %vm22_vm0, %v108_v40 }
  0xb0   :  { %v103_v47 = vadd.f32 %v186_v33, %v95_v44  ;;  %113 = vst.msk [vmem:[#allocation3 + $0x8] sm:$0xff] %vm22_vm0, %v109_v43 }
  0xb1   :  { %v110_v48 = vadd.f32 %v106_v42, %v102_v45 }
  0xb2   :  { %v111_v49 = vadd.f32 %v107_v46, %v103_v47 }
  0xb3   :  { %114 = vst.msk [vmem:[#allocation3 + $0x10] sm:$0xff] %vm22_vm0, %v110_v48 }
  0xb4   :  { %115 = vst.msk [vmem:[#allocation3 + $0x18] sm:$0xff] %vm22_vm0, %v111_v49 }
  0xb5   :  { %128 = dma.vmem_to_hbm [thread:$0]  %s121_s9, 512, %s123_s12, [#allocation4], %s215_s4, %s215_s4, %s216_s15  }
  0xb6   :  { %211 = dma.done.wait [#allocation4], 512  }
  0xb7   :  { %212 = vsyncadd [#allocation4], 4294966784 }
  0xb8   :  { %133 = vsyncpa [#allocation4], 1 }

// kernel: block_forward.5
= control target key start
LH: loop header
LB: loop body
LE: loop exit
PB: predicated region body
PF: predicated region fallthrough
CT: control target
= control target key end

     0   :  { %s2137_s12 = smov 0   ;;  %s2139_s13 = smov 0   ;;  %s2708_s0 = inlined_call_operand.vmem [shape: f32[2,16,3,4,8], index: 0, kind: input, shape index: {}, may-alias: {0,1,2}]   ;;  %s2709_s1 = inlined_call_operand.vmem [shape: f32[2,16,3,4,8], index: 1, kind: input, shape index: {}, may-alias: {0,1,2}]   ;;  %s2710_s2 = inlined_call_operand.vmem [shape: f32[2,16,3,4,8], index: 2, kind: input, shape index: {}, may-alias: {0,1,2}]   ;;  %s2711_s3 = inlined_call_operand.vmem [shape: f32[2,16,4,8], index: 3, kind: output, shape index: {}]  }
   0x1   :  { %s2141_s14 = smov 0   ;;  %s2143_s15 = smov 0  }
   0x2   :  { %s2145_s16 = smov 0  }
   0x3 LB: > { %s39_s17 = sadd.s32 1, %s2106_s15  ;;  %p57_p1 = scmp.ne.s32.totalorder %s2098_s13, %s2094_s12  ;;  %s2110_s16 = sphi %s2145_s16, %s13_s16   ;;  %s2106_s15 = sphi %s2143_s15, %s2716_s15   ;;  %s2102_s14 = sphi %s2141_s14, %s2715_s14   ;;  %s2098_s13 = sphi %s2139_s13, %s2714_s13   ;;  %s2094_s12 = sphi %s2137_s12, %s2713_s12  }
   0x4   : > { %p41_p0 = scmp.ge.s32.totalorder %s39_s17, 2  ;;  %p58_p2 = scmp.eq.s32.totalorder %s2110_s16, 0 }
   0x5   : > { %s50_s20 = sadd.s32 1, %s2098_s13  ;;  %p1903_p5 = scmp.ge.s32.totalorder %s2110_s16, 2 }
   0x6   : > { %s2718_s17 = smov (%p41_p0, %s39_s17), 0  ;;  %p2168_p3 = por %p58_p2, %p57_p1 }
   0x7   : > { %s43_s19 = ssub.s32 %s2106_s15, %s2718_s17  ;;  %173 = sbr.rel (%p1903_p5) target bundleno = 75 (0x4b), region = 16 }
   0x8   : > { %p48_p4 = scmp.eq.s32.totalorder %s43_s19, 0 }
   0xa   : > { %s2176_s21 = scalar_select %p48_p4, %s2098_s13, %s50_s20  }
   0xc   : > { %176 = sbr.rel (!%p2168_p3) target bundleno = 33 (0x21), region = 20  ;;  %s178_s22 = sand.u32 (%p2168_p3), 1, %s2098_s13  }
   0xd   : > { %s1975_s23 = smul.u32 (%p2168_p3), 192, %s2106_s15  ;;  %s1904_s24 = sshll.u32 (%p2168_p3), %s178_s22, 6 }
   0xe   : > { %s180_s28 = scalar_lea.vmem (%p2168_p3), [#allocation5], %s1904_s24 }
   0xf   : > { %s2186_s27 = scalar_lea.vmem (%p2168_p3), %s2708_s0, %s1975_s23 }
  0x10   : > { %v204_v0 = vld [vmem:[%s2186_s27] sm:$0xf] (%p2168_p3)  ;;  %v206_v1 = vld [vmem:[%s2186_s27 + $0xc] sm:$0xf] (%p2168_p3)  ;;  %v208_v2 = vld [vmem:[%s2186_s27 + $0x18] sm:$0xf] (%p2168_p3) }
  0x11   : > { %205 = vst [vmem:[%s180_s28] sm:$0xf] %v204_v0  ;;  %v210_v3 = vld [vmem:[%s2186_s27 + $0x24] sm:$0xf]  ;;  %v212_v4 = vld [vmem:[%s2186_s27 + $0x30] sm:$0xf] }
  0x12   : > { %207 = vst [vmem:[%s180_s28 + $0x4] sm:$0xf] %v206_v1  ;;  %v214_v5 = vld [vmem:[%s2186_s27 + $0x3c] sm:$0xf]  ;;  %v216_v6 = vld [vmem:[%s2186_s27 + $0x48] sm:$0xf] }
  0x13   : > { %209 = vst [vmem:[%s180_s28 + $0x8] sm:$0xf] %v208_v2  ;;  %v218_v7 = vld [vmem:[%s2186_s27 + $0x54] sm:$0xf]  ;;  %v220_v8 = vld [vmem:[%s2186_s27 + $0x60] sm:$0xf] }
  0x14   : > { %211 = vst [vmem:[%s180_s28 + $0xc] sm:$0xf] %v210_v3  ;;  %v222_v9 = vld [vmem:[%s2186_s27 + $0x6c] sm:$0xf]  ;;  %v224_v10 = vld [vmem:[%s2186_s27 + $0x78] sm:$0xf] }
  0x15   : > { %213 = vst [vmem:[%s180_s28 + $0x10] sm:$0xf] %v212_v4  ;;  %v226_v11 = vld [vmem:[%s2186_s27 + $0x84] sm:$0xf]  ;;  %v228_v12 = vld [vmem:[%s2186_s27 + $0x90] sm:$0xf] }
  0x16   : > { %215 = vst [vmem:[%s180_s28 + $0x14] sm:$0xf] %v214_v5  ;;  %v230_v13 = vld [vmem:[%s2186_s27 + $0x9c] sm:$0xf]  ;;  %v232_v14 = vld [vmem:[%s2186_s27 + $0xa8] sm:$0xf] }
  0x17   : > { %217 = vst [vmem:[%s180_s28 + $0x18] sm:$0xf] %v216_v6  ;;  %v234_v15 = vld [vmem:[%s2186_s27 + $0xb4] sm:$0xf] }
  0x18   : > { %219 = vst [vmem:[%s180_s28 + $0x1c] sm:$0xf] %v218_v7 }
  0x19   : > { %221 = vst [vmem:[%s180_s28 + $0x20] sm:$0xf] %v220_v8 }
  0x1a   : > { %223 = vst [vmem:[%s180_s28 + $0x24] sm:$0xf] %v222_v9 }
  0x1b   : > { %225 = vst [vmem:[%s180_s28 + $0x28] sm:$0xf] %v224_v10 }
  0x1c   : > { %227 = vst [vmem:[%s180_s28 + $0x2c] sm:$0xf] %v226_v11 }
  0x1d   : > { %229 = vst [vmem:[%s180_s28 + $0x30] sm:$0xf] %v228_v12 }
  0x1e   : > { %231 = vst [vmem:[%s180_s28 + $0x34] sm:$0xf] %v230_v13 }
  0x1f   : > { %233 = vst [vmem:[%s180_s28 + $0x38] sm:$0xf] %v232_v14 }
  0x20   : > { %235 = vst [vmem:[%s180_s28 + $0x3c] sm:$0xf] %v234_v15 }
  0x21 PF: > { %291 = sbr.rel (!%p2168_p3) target bundleno = 54 (0x36), region = 61  ;;  %s293_s29 = sand.u32 (%p2168_p3), 1, %s2098_s13  }
  0x22   : > { %s1907_s30 = smul.u32 (%p2168_p3), 192, %s2106_s15  ;;  %s1906_s4 = sshll.u32 (%p2168_p3), %s293_s29, 6 }
  0x23   : > { %s295_s8 = scalar_lea.vmem (%p2168_p3), [#allocation6], %s1906_s4 }
  0x24   : > { %s2211_s7 = scalar_lea.vmem (%p2168_p3), %s2709_s1, %s1907_s30 }
  0x25   : > { %v1908_v16 = vld [vmem:[%s2211_s7 + $0x4] sm:$0xf] (%p2168_p3)  ;;  %v1909_v17 = vld [vmem:[%s2211_s7 + $0x10] sm:$0xf] (%p2168_p3)  ;;  %v1910_v18 = vld [vmem:[%s2211_s7 + $0x1c] sm:$0xf] (%p2168_p3) }
  0x26   : > { %321 = vst [vmem:[%s295_s8] sm:$0xf] %v1908_v16  ;;  %v1911_v19 = vld [vmem:[%s2211_s7 + $0x28] sm:$0xf]  ;;  %v1912_v20 = vld [vmem:[%s2211_s7 + $0x34] sm:$0xf] }
  0x27   : > { %323 = vst [vmem:[%s295_s8 + $0x4] sm:$0xf] %v1909_v17  ;;  %v1913_v21 = vld [vmem:[%s2211_s7 + $0x40] sm:$0xf]  ;;  %v1914_v22 = vld [vmem:[%s2211_s7 + $0x4c] sm:$0xf] }
  0x28   : > { %325 = vst [vmem:[%s295_s8 + $0x8] sm:$0xf] %v1910_v18  ;;  %v1915_v23 = vld [vmem:[%s2211_s7 + $0x58] sm:$0xf]  ;;  %v1916_v24 = vld [vmem:[%s2211_s7 + $0x64] sm:$0xf] }
  0x29   : > { %327 = vst [vmem:[%s295_s8 + $0xc] sm:$0xf] %v1911_v19  ;;  %v1917_v25 = vld [vmem:[%s2211_s7 + $0x70] sm:$0xf]  ;;  %v1918_v26 = vld [vmem:[%s2211_s7 + $0x7c] sm:$0xf] }
  0x2a   : > { %329 = vst [vmem:[%s295_s8 + $0x10] sm:$0xf] %v1912_v20  ;;  %v1919_v27 = vld [vmem:[%s2211_s7 + $0x88] sm:$0xf]  ;;  %v1920_v28 = vld [vmem:[%s2211_s7 + $0x94] sm:$0xf] }
  0x2b   : > { %331 = vst [vmem:[%s295_s8 + $0x14] sm:$0xf] %v1913_v21  ;;  %v1921_v29 = vld [vmem:[%s2211_s7 + $0xa0] sm:$0xf]  ;;  %v1922_v30 = vld [vmem:[%s2211_s7 + $0xac] sm:$0xf] }
  0x2c   : > { %333 = vst [vmem:[%s295_s8 + $0x18] sm:$0xf] %v1914_v22  ;;  %v1923_v31 = vld [vmem:[%s2211_s7 + $0xb8] sm:$0xf] }
  0x2d   : > { %335 = vst [vmem:[%s295_s8 + $0x1c] sm:$0xf] %v1915_v23 }
  0x2e   : > { %337 = vst [vmem:[%s295_s8 + $0x20] sm:$0xf] %v1916_v24 }
  0x2f   : > { %339 = vst [vmem:[%s295_s8 + $0x24] sm:$0xf] %v1917_v25 }
  0x30   : > { %341 = vst [vmem:[%s295_s8 + $0x28] sm:$0xf] %v1918_v26 }
  0x31   : > { %343 = vst [vmem:[%s295_s8 + $0x2c] sm:$0xf] %v1919_v27 }
  0x32   : > { %345 = vst [vmem:[%s295_s8 + $0x30] sm:$0xf] %v1920_v28 }
  0x33   : > { %347 = vst [vmem:[%s295_s8 + $0x34] sm:$0xf] %v1921_v29 }
  0x34   : > { %349 = vst [vmem:[%s295_s8 + $0x38] sm:$0xf] %v1922_v30 }
  0x35   : > { %351 = vst [vmem:[%s295_s8 + $0x3c] sm:$0xf] %v1923_v31 }
  0x36 PF: > { %407 = sbr.rel (!%p2168_p3) target bundleno = 75 (0x4b), region = 102  ;;  %s409_s9 = sand.u32 (%p2168_p3), 1, %s2098_s13  }
  0x37   : > { %s1925_s10 = smul.u32 (%p2168_p3), 192, %s2106_s15  ;;  %s1924_s11 = sshll.u32 (%p2168_p3), %s409_s9, 6 }
  0x38   : > { %s411_s18 = scalar_lea.vmem (%p2168_p3), [#allocation7], %s1924_s11 }
  0x39   : > { %s2236_s22 = scalar_lea.vmem (%p2168_p3), %s2710_s2, %s1925_s10 }
  0x3a   : > { %v1926_v32 = vld [vmem:[%s2236_s22 + $0x8] sm:$0xf] (%p2168_p3)  ;;  %v1927_v33 = vld [vmem:[%s2236_s22 + $0x14] sm:$0xf] (%p2168_p3)  ;;  %v1928_v34 = vld [vmem:[%s2236_s22 + $0x20] sm:$0xf] (%p2168_p3) }
  0x3b   : > { %437 = vst [vmem:[%s411_s18] sm:$0xf] %v1926_v32  ;;  %v1929_v35 = vld [vmem:[%s2236_s22 + $0x2c] sm:$0xf]  ;;  %v1930_v36 = vld [vmem:[%s2236_s22 + $0x38] sm:$0xf] }
  0x3c   : > { %439 = vst [vmem:[%s411_s18 + $0x4] sm:$0xf] %v1927_v33  ;;  %v1931_v37 = vld [vmem:[%s2236_s22 + $0x44] sm:$0xf]  ;;  %v1932_v38 = vld [vmem:[%s2236_s22 + $0x50] sm:$0xf] }
  0x3d   : > { %441 = vst [vmem:[%s411_s18 + $0x8] sm:$0xf] %v1928_v34  ;;  %v1933_v39 = vld [vmem:[%s2236_s22 + $0x5c] sm:$0xf]  ;;  %v1934_v40 = vld [vmem:[%s2236_s22 + $0x68] sm:$0xf] }
  0x3e   : > { %443 = vst [vmem:[%s411_s18 + $0xc] sm:$0xf] %v1929_v35  ;;  %v1935_v41 = vld [vmem:[%s2236_s22 + $0x74] sm:$0xf]  ;;  %v1936_v42 = vld [vmem:[%s2236_s22 + $0x80] sm:$0xf] }
  0x3f   : > { %445 = vst [vmem:[%s411_s18 + $0x10] sm:$0xf] %v1930_v36  ;;  %v1937_v43 = vld [vmem:[%s2236_s22 + $0x8c] sm:$0xf]  ;;  %v1938_v44 = vld [vmem:[%s2236_s22 + $0x98] sm:$0xf] }
  0x40   : > { %447 = vst [vmem:[%s411_s18 + $0x14] sm:$0xf] %v1931_v37  ;;  %v1939_v45 = vld [vmem:[%s2236_s22 + $0xa4] sm:$0xf]  ;;  %v1940_v46 = vld [vmem:[%s2236_s22 + $0xb0] sm:$0xf] }
  0x41   : > { %449 = vst [vmem:[%s411_s18 + $0x18] sm:$0xf] %v1932_v38  ;;  %v1941_v47 = vld [vmem:[%s2236_s22 + $0xbc] sm:$0xf] }
  0x42   : > { %451 = vst [vmem:[%s411_s18 + $0x1c] sm:$0xf] %v1933_v39 }
  0x43   : > { %453 = vst [vmem:[%s411_s18 + $0x20] sm:$0xf] %v1934_v40 }
  0x44   : > { %455 = vst [vmem:[%s411_s18 + $0x24] sm:$0xf] %v1935_v41 }
  0x45   : > { %457 = vst [vmem:[%s411_s18 + $0x28] sm:$0xf] %v1936_v42 }
  0x46   : > { %459 = vst [vmem:[%s411_s18 + $0x2c] sm:$0xf] %v1937_v43 }
  0x47   : > { %461 = vst [vmem:[%s411_s18 + $0x30] sm:$0xf] %v1938_v44 }
  0x48   : > { %463 = vst [vmem:[%s411_s18 + $0x34] sm:$0xf] %v1939_v45 }
  0x49   : > { %465 = vst [vmem:[%s411_s18 + $0x38] sm:$0xf] %v1940_v46 }
  0x4a   : > { %467 = vst [vmem:[%s411_s18 + $0x3c] sm:$0xf] %v1941_v47 }
  0x4b PF: > { %p1942_p6 = scmp.ge.s32.totalorder %s2110_s16, 1  ;;  %p522_p7 = scmp.lt.s32.totalorder %s2110_s16, 3 }
  0x4d   : > { %p523_p8 = pnand %p1942_p6, %p522_p7 }
  0x4e   : > { %s529_s23 = sand.u32 (!%p523_p8), 1, %s2094_s12   ;;  %p585_p9 = scmp.lt.s32.totalorder (!%p523_p8), %s2102_s14, 1 }
  0x4f   : > { %526 = sbr.rel (%p523_p8) target bundleno = 784 (0x310), region = 143  ;;  %s2257_s24 = sshll.u32 (!%p523_p8), %s529_s23, 6 }
  0x50   : > { %s2260_s25 = scalar_lea.vmem (!%p523_p8), [#allocation6], %s2257_s24  ;;  %s2303_s12 = scalar_lea.vmem (!%p523_p8), [#allocation5], %s2257_s24 }
  0x51   : > { %s2496_s26 = scalar_lea.vmem (!%p523_p8), [#allocation7], %s2257_s24 }
  0x54   : > { %v2112_v48 = vmov 1983009808   ;;  %vm644_vm0 = vcmask 1047556   ;;  %v2113_v50 = vmov 1934713408   ;;  %vm618_vm1 = vcmask 64512  }
  0x55   : > { %v647_v49 = vunpack.c.l.s4 %v2112_v48  ;;  %v673_v51 = vunpack.c.l.s4 %v2113_v50  ;;  %v764_v52 = vld [vmem:[%s2260_s25 + $0x20] sm:$0xf]  ;;  %v765_v53 = vld [vmem:[%s2260_s25 + $0x24] sm:$0xf]  ;;  %v766_v54 = vld [vmem:[%s2260_s25 + $0x28] sm:$0xf] }
  0x56   : > { %v767_v55 = vld [vmem:[%s2260_s25 + $0x2c] sm:$0xf]  ;;  %v768_v56 = vld [vmem:[%s2260_s25 + $0x30] sm:$0xf]  ;;  %v769_v57 = vld [vmem:[%s2260_s25 + $0x34] sm:$0xf] }
  0x57   : > { %v2268_v58 = vunpack.c.0.s8 %v647_v49  ;;  %v770_v59 = vld [vmem:[%s2260_s25 + $0x38] sm:$0xf]  ;;  %v771_v60 = vld [vmem:[%s2260_s25 + $0x3c] sm:$0xf]  ;;  %v828_v61 = vrot.slane %v766_v54, 4  ;;  %v834_v62 = vrot.slane %v767_v55, 4  ;;  %v2272_v1 = vunpack.c.0.s8 %v673_v51 }
  0x58   : > { %v840_v63 = vrot.slane %v770_v59, 4  ;;  %v846_v0 = vrot.slane %v771_v60, 4  ;;  %v756_v4 = vld [vmem:[%s2260_s25] sm:$0xf]  ;;  %v758_v5 = vld [vmem:[%s2260_s25 + $0x8] sm:$0xf] }
  0x59   : > { %v829_v2 = vsel %vm644_vm0, %v828_v61, %v764_v52  ;;  %v835_v3 = vsel %vm644_vm0, %v834_v62, %v765_v53  ;;  %v759_v6 = vld [vmem:[%s2260_s25 + $0xc] sm:$0xf]  ;;  %v757_v11 = vld [vmem:[%s2260_s25 + $0x4] sm:$0xf]  ;;  %v762_v12 = vld [vmem:[%s2260_s25 + $0x18] sm:$0xf] }
  0x5a   : > { %v833_v7 = vperm.slane %v829_v2, %v2268_v58  ;;  %v839_v8 = vperm.slane %v835_v3, %v2268_v58  ;;  %v841_v9 = vsel %vm644_vm0, %v840_v63, %v768_v56  ;;  %v847_v10 = vsel %vm644_vm0, %v846_v0, %v769_v57  ;;  %v763_v13 = vld [vmem:[%s2260_s25 + $0x1c] sm:$0xf]  ;;  %v760_v24 = vld [vmem:[%s2260_s25 + $0x10] sm:$0xf]  ;;  %v761_v25 = vld [vmem:[%s2260_s25 + $0x14] sm:$0xf] }
  0x5b   : > { %v845_v14 = vperm.slane %v841_v9, %v2268_v58  ;;  %v851_v15 = vperm.slane %v847_v10, %v2268_v58  ;;  %v772_v16 = vrot.slane %v758_v5, 4  ;;  %v778_v17 = vrot.slane %v759_v6, 4  ;;  %v629_v36 = vld [vmem:[%s2303_s12 + $0x8] sm:$0xf]  ;;  %v630_v37 = vld [vmem:[%s2303_s12 + $0xc] sm:$0xf] }
  0x5c   : > { %v852_v18 = vrot.slane %v839_v8, 4  ;;  %v854_v19 = vrot.slane %v833_v7, 4  ;;  %v784_v20 = vrot.slane %v762_v12, 4  ;;  %v790_v21 = vrot.slane %v763_v13, 4  ;;  %v627_v46 = vld [vmem:[%s2303_s12] sm:$0xf] }
  0x5d   : > { %v864_v22 = vrot.slane %v851_v15, 4  ;;  %v866_v23 = vrot.slane %v845_v14, 4  ;;  %v773_v26 = vsel %vm644_vm0, %v772_v16, %v756_v4  ;;  %v779_v27 = vsel %vm644_vm0, %v778_v17, %v757_v11  ;;  %v633_v49 = vld [vmem:[%s2303_s12 + $0x18] sm:$0xf]  ;;  %v628_v56 = vld [vmem:[%s2303_s12 + $0x4] sm:$0xf] }
  0x5e   : > { %v853_v28 = vsel %vm644_vm0, %v852_v18, %v833_v7  ;;  %v855_v29 = vsel %vm644_vm0, %v839_v8, %v854_v19  ;;  %v777_v30 = vperm.slane %v773_v26, %v2268_v58  ;;  %v783_v31 = vperm.slane %v779_v27, %v2268_v58  ;;  %v631_v62 = vld [vmem:[%s2303_s12 + $0x10] sm:$0xf]  ;;  %v634_v63 = vld [vmem:[%s2303_s12 + $0x1c] sm:$0xf]  ;;  %v632_v7 = vld [vmem:[%s2303_s12 + $0x14] sm:$0xf] }
  0x5f   : > { %v2297_v32 = vperm.slane %v853_v28, %v2272_v1  ;;  %v865_v33 = vsel %vm644_vm0, %v864_v22, %v845_v14  ;;  %v863_v34 = vperm.slane %v855_v29, %v2272_v1  ;;  %v867_v35 = vsel %vm644_vm0, %v851_v15, %v866_v23  ;;  %v637_v26 = vld [vmem:[%s2303_s12 + $0x28] sm:$0xf]  ;;  %v638_v27 = vld [vmem:[%s2303_s12 + $0x2c] sm:$0xf]  ;;  %v641_v28 = vld [vmem:[%s2303_s12 + $0x38] sm:$0xf] }
  0x60   : > { %v871_v38 = vperm.slane %v865_v33, %v2272_v1  ;;  %v875_v39 = vperm.slane %v867_v35, %v2272_v1  ;;  %v785_v40 = vsel %vm644_vm0, %v784_v20, %v760_v24  ;;  %v791_v41 = vsel %vm644_vm0, %v790_v21, %v761_v25  ;;  %v635_v33 = vld [vmem:[%s2303_s12 + $0x20] sm:$0xf]  ;;  %s2720_s14 = smov (!%p585_p9, %s2102_s14), 1 }
  0x61   : > { %v789_v42 = vperm.slane %v785_v40, %v2268_v58  ;;  %v795_v43 = vperm.slane %v791_v41, %v2268_v58  ;;  %v796_v44 = vrot.slane %v783_v31, 4  ;;  %v798_v45 = vrot.slane %v777_v30, 4  ;;  %v639_v40 = vld [vmem:[%s2303_s12 + $0x30] sm:$0xf]  ;;  %s1974_s27 = sshll.u32 %s2720_s14, 6 }
  0x62   : > { %v876_v47 = vrot.slane %v871_v38, 4  ;;  %v880_v48 = vrot.slane %v875_v39, 4  ;;  %v643_v50 = vrot.slane %v629_v36, 4  ;;  %v650_v51 = vrot.slane %v630_v37, 4  ;;  %s2626_s30 = scalar_lea.vmem %s2711_s3, %s1974_s27 }
  0x63   : > { %v797_v52 = vsel %vm644_vm0, %v796_v44, %v777_v30  ;;  %v808_v53 = vrot.slane %v795_v43, 4  ;;  %v799_v54 = vsel %vm644_vm0, %v783_v31, %v798_v45  ;;  %v810_v55 = vrot.slane %v789_v42, 4 }
  0x64   : > { %v877_v57 = vsel %vm644_vm0, %v876_v47, %v2297_v32  ;;  %v881_v59 = vsel %vm644_vm0, %v880_v48, %v863_v34  ;;  %v803_v60 = vperm.slane %v797_v52, %v2272_v1  ;;  %v807_v61 = vperm.slane %v799_v54, %v2272_v1  ;;  %v642_v48 = vld [vmem:[%s2303_s12 + $0x3c] sm:$0xf]  ;;  %v640_v54 = vld [vmem:[%s2303_s12 + $0x34] sm:$0xf] }
  0x65   : > { %1948 = vmatpush.xpose.msk.msra.mxu0 %vm618_vm1, %v877_v57  ;;  %1956 = vmatpush.xpose.msk.msra.mxu2 %vm618_vm1, %v881_v59  ;;  %v809_v0 = vsel %vm644_vm0, %v808_v53, %v789_v42  ;;  %v811_v2 = vsel %vm644_vm0, %v795_v43, %v810_v55  ;;  %v645_v3 = vsel %vm644_vm0, %v643_v50, %v627_v46  ;;  %v656_v4 = vrot.slane %v633_v49, 4 }
  0x66   : > { %v815_v5 = vperm.slane %v809_v0, %v2272_v1  ;;  %v819_v6 = vperm.slane %v811_v2, %v2272_v1  ;;  %v649_v8 = vperm.slane %v645_v3, %v2268_v58  ;;  %v651_v9 = vsel %vm644_vm0, %v650_v51, %v628_v56 }
  0x67   : > { %v655_v10 = vperm.slane %v651_v9, %v2268_v58  ;;  %v657_v11 = vsel %vm644_vm0, %v656_v4, %v631_v62  ;;  %v662_v12 = vrot.slane %v634_v63, 4  ;;  %v882_v13 = vrot.slane %v863_v34, 4  ;;  %v636_v34 = vld [vmem:[%s2303_s12 + $0x24] sm:$0xf] }
  0x68   : > { %v820_v14 = vrot.slane %v815_v5, 4  ;;  %v824_v15 = vrot.slane %v819_v6, 4  ;;  %v661_v16 = vperm.slane %v657_v11, %v2268_v58  ;;  %v670_v17 = vrot.slane %v649_v8, 4 }
  0x69   : > { %v663_v18 = vsel %vm644_vm0, %v662_v12, %v632_v7  ;;  %v668_v19 = vrot.slane %v655_v10, 4  ;;  %v883_v20 = vsel %vm644_vm0, %v875_v39, %v882_v13  ;;  %v878_v21 = vrot.slane %v2297_v32, 4 }
  0x6a   : > { %v821_v22 = vsel %vm644_vm0, %v820_v14, %v803_v60  ;;  %v825_v23 = vsel %vm644_vm0, %v824_v15, %v807_v61  ;;  %v667_v24 = vperm.slane %v663_v18, %v2268_v58  ;;  %v671_v25 = vsel %vm644_vm0, %v655_v10, %v670_v17  ;;  %1960 = vmatpush.xpose.msk.msra.mxu3 %vm618_vm1, %v883_v20 }
  0x6b   : > { %1949 = vmatpush.xpose.msk.msra.mxu0 %vm618_vm1, %v821_v22  ;;  %1957 = vmatpush.xpose.msk.msra.mxu2 %vm618_vm1, %v825_v23  ;;  %v669_v29 = vsel %vm644_vm0, %v668_v19, %v649_v8  ;;  %v679_v30 = vperm.slane %v671_v25, %v2272_v1  ;;  %v682_v31 = vrot.slane %v661_v16, 4  ;;  %v879_v32 = vsel %vm644_vm0, %v871_v38, %v878_v21 }
  0x6c   : > { %v675_v35 = vperm.slane %v669_v29, %v2272_v1  ;;  %v680_v36 = vrot.slane %v667_v24, 4  ;;  %1952 = vmatpush.xpose.msk.msra.mxu1 %vm618_vm1, %v879_v32  ;;  %v826_v37 = vrot.slane %v807_v61, 4  ;;  %v822_v39 = vrot.slane %v803_v60, 4 }
  0x6d   : > { %v683_v41 = vsel %vm644_vm0, %v667_v24, %v682_v31  ;;  %v700_v42 = vrot.slane %v637_v26, 4  ;;  %v706_v43 = vrot.slane %v638_v27, 4  ;;  %v712_v44 = vrot.slane %v641_v28, 4 }
  0x6e   : > { %v681_v45 = vsel %vm644_vm0, %v680_v36, %v661_v16  ;;  %v691_v38 = vperm.slane %v683_v41, %v2272_v1  ;;  %v827_v46 = vsel %vm644_vm0, %v819_v6, %v826_v37  ;;  %v823_v47 = vsel %vm644_vm0, %v815_v5, %v822_v39 }
  0x6f   : > { %v687_v49 = vperm.slane %v681_v45, %v2272_v1  ;;  %1961 = vmatpush.xpose.msk.msra.mxu3 %vm618_vm1, %v827_v46  ;;  %v701_v50 = vsel %vm644_vm0, %v700_v42, %v635_v33  ;;  %v707_v51 = vsel %vm644_vm0, %v706_v43, %v636_v34  ;;  %v713_v52 = vsel %vm644_vm0, %v712_v44, %v639_v40 }
  0x70   : > { %v696_v53 = vrot.slane %v691_v38, 4  ;;  %1953 = vmatpush.xpose.msk.msra.mxu1 %vm618_vm1, %v823_v47  ;;  %v705_v55 = vperm.slane %v701_v50, %v2268_v58  ;;  %v711_v56 = vperm.slane %v707_v51, %v2268_v58  ;;  %v717_v57 = vperm.slane %v713_v52, %v2268_v58 }
  0x71   : > { %v692_v59 = vrot.slane %v687_v49, 4  ;;  %v718_v60 = vrot.slane %v642_v48, 4  ;;  %v698_v61 = vrot.slane %v679_v30, 4  ;;  %v694_v62 = vrot.slane %v675_v35, 4 }
  0x72   : > { %v697_v63 = vsel %vm644_vm0, %v696_v53, %v679_v30  ;;  %v726_v0 = vrot.slane %v705_v55, 4  ;;  %v738_v2 = vrot.slane %v717_v57, 4  ;;  %v724_v3 = vrot.slane %v711_v56, 4 }
  0x73   : > { %v693_v4 = vsel %vm644_vm0, %v692_v59, %v675_v35  ;;  %1958 = vmatmul.msk.f32.vlgmr.msra.gmra.mxu2 %vm618_vm1, %v697_v63  ;;  %v719_v5 = vsel %vm644_vm0, %v718_v60, %v640_v54  ;;  %v699_v6 = vsel %vm644_vm0, %v691_v38, %v698_v61  ;;  %v695_v7 = vsel %vm644_vm0, %v687_v49, %v694_v62 }
  0x74   : > { %1950 = vmatmul.msk.f32.vlgmr.msra.gmra.mxu0 %vm618_vm1, %v693_v4  ;;  %v723_v8 = vperm.slane %v719_v5, %v2268_v58  ;;  %v727_v9 = vsel %vm644_vm0, %v711_v56, %v726_v0  ;;  %1962 = vmatmul.msk.f32.vlgmr.msra.gmra.mxu3 %vm618_vm1, %v699_v6  ;;  %v725_v10 = vsel %vm644_vm0, %v724_v3, %v705_v55  ;;  %vm601_vm2 = vcmask 7168  }
  0x75   : > { %v735_v11 = vperm.slane %v727_v9, %v2272_v1  ;;  %1954 = vmatmul.msk.f32.vlgmr.msra.gmra.mxu1 %vm618_vm1, %v695_v7  ;;  %v731_v12 = vperm.slane %v725_v10, %v2272_v1  ;;  %v2114_v26 = vmov -inf   ;;  %vm1169_vm3 = vcmask 130048  }
  0x76   : > { %v739_v13 = vsel %vm644_vm0, %v723_v8, %v738_v2  ;;  %v736_v14 = vrot.slane %v723_v8, 4  ;;  %602 = vst.msk [vmem:[#allocation2] sm:$0xff] %vm601_vm2, %v2114_v26  ;;  %v2115_v51 = vmov 0   ;;  %v2116_v52 = vmov 0.0  }
  0x77   : > { %v747_v15 = vperm.slane %v739_v13, %v2272_v1  ;;  %v754_v16 = vrot.slane %v735_v11, 4  ;;  %v750_v17 = vrot.slane %v731_v12, 4  ;;  %603 = vst.msk [vmem:[#allocation2 + $0x8] sm:$0xff] %vm601_vm2, %v2114_v26  ;;  %2023 = vset.pattern.permute.xlu1 %v2115_v51  ;;  %2021 = vset.pattern.permute.xlu2 %v2115_v51  ;;  %vm1730_vm4 = vcmask 60416  }
  0x78   : > { %v737_v18 = vsel %vm644_vm0, %v736_v14, %v717_v57  ;;  %604 = vst.msk [vmem:[#allocation2 + $0x10] sm:$0xff] %vm601_vm2, %v2114_v26  ;;  %2022 = vset.pattern.permute.xlu0 %v2115_v51 }
  0x79   : > { %v752_v19 = vrot.slane %v747_v15, 4  ;;  %v755_v20 = vsel %vm644_vm0, %v747_v15, %v754_v16  ;;  %v743_v21 = vperm.slane %v737_v18, %v2272_v1  ;;  %605 = vst.msk [vmem:[#allocation2 + $0x18] sm:$0xff] %vm601_vm2, %v2114_v26 }
  0x7a   : > { %606 = vst.msk [vmem:[#allocation2 + $0x20] sm:$0xff] %vm601_vm2, %v2114_v26 }
  0x7b   : > { %v753_v22 = vsel %vm644_vm0, %v752_v19, %v735_v11  ;;  %v748_v23 = vrot.slane %v743_v21, 4  ;;  %v751_v24 = vsel %vm644_vm0, %v743_v21, %v750_v17  ;;  %607 = vst.msk [vmem:[#allocation2 + $0x28] sm:$0xff] %vm601_vm2, %v2114_v26 }
  0x7c   : > { %1959 = vmatmul.msk.f32.gmra.mxu2 %vm618_vm1, %v753_v22  ;;  %1963 = vmatmul.msk.f32.gmra.mxu3 %vm618_vm1, %v755_v20  ;;  %608 = vst.msk [vmem:[#allocation2 + $0x30] sm:$0xff] %vm601_vm2, %v2114_v26 }
  0x7d   : > { %v749_v25 = vsel %vm644_vm0, %v748_v23, %v731_v12  ;;  %1955 = vmatmul.msk.f32.gmra.mxu1 %vm618_vm1, %v751_v24  ;;  %609 = vst.msk [vmem:[#allocation2 + $0x38] sm:$0xff] %vm601_vm2, %v2114_v26  ;;  %v1161_v53 = vld [vmem:[#allocation2] sm:$0xff] }
  0x7e   : > { %1951 = vmatmul.msk.f32.gmra.mxu0 %vm618_vm1, %v749_v25  ;;  %620 = vst.msk [vmem:[#allocation4 + $0x8] sm:$0xff] %vm618_vm1, %v2116_v52  ;;  %v1162_v12 = vld [vmem:[#allocation2 + $0x8] sm:$0xff] }
  0x7f   : > { %610 = vst.msk [vmem:[#allocation3] sm:$0xff] %vm601_vm2, %v2116_v52  ;;  %v1163_v60 = vld [vmem:[#allocation2 + $0x10] sm:$0xff] }
  0x80   : > { %611 = vst.msk [vmem:[#allocation3 + $0x8] sm:$0xff] %vm601_vm2, %v2116_v52  ;;  %v1164_v7 = vld [vmem:[#allocation2 + $0x18] sm:$0xff] }
  0x81   : > { %612 = vst.msk [vmem:[#allocation3 + $0x10] sm:$0xff] %vm601_vm2, %v2116_v52  ;;  %v1165_v56 = vld [vmem:[#allocation2 + $0x20] sm:$0xff] }
  0x82   : > { %613 = vst.msk [vmem:[#allocation3 + $0x18] sm:$0xff] %vm601_vm2, %v2116_v52  ;;  %v1166_v2 = vld [vmem:[#allocation2 + $0x28] sm:$0xff] }
  0x83   : > { %614 = vst.msk [vmem:[#allocation3 + $0x20] sm:$0xff] %vm601_vm2, %v2116_v52  ;;  %v1167_v0 = vld [vmem:[#allocation2 + $0x30] sm:$0xff] }
  0x84   : > { %615 = vst.msk [vmem:[#allocation3 + $0x28] sm:$0xff] %vm601_vm2, %v2116_v52  ;;  %v2463_v13 = vld [vmem:[#allocation2 + $0x38] sm:$0xff] }
  0x85   : > { %616 = vst.msk [vmem:[#allocation3 + $0x30] sm:$0xff] %vm601_vm2, %v2116_v52 }
  0x86   : > { %617 = vst.msk [vmem:[#allocation3 + $0x38] sm:$0xff] %vm601_vm2, %v2116_v52 }
  0x87   : > { %619 = vst.msk [vmem:[#allocation4] sm:$0xff] %vm618_vm1, %v2116_v52 }
  0x88   : > { %621 = vst.msk [vmem:[#allocation4 + $0x10] sm:$0xff] %vm618_vm1, %v2116_v52 }
  0x89   : > { %622 = vst.msk [vmem:[#allocation4 + $0x18] sm:$0xff] %vm618_vm1, %v2116_v52 }
  0x8a   : > { %623 = vst.msk [vmem:[#allocation4 + $0x20] sm:$0xff] %vm618_vm1, %v2116_v52 }
  0x8b   : > { %624 = vst.msk [vmem:[#allocation4 + $0x28] sm:$0xff] %vm618_vm1, %v2116_v52 }
  0x8c   : > { %625 = vst.msk [vmem:[#allocation4 + $0x30] sm:$0xff] %vm618_vm1, %v2116_v52 }
  0x8d   : > { %626 = vst.msk [vmem:[#allocation4 + $0x38] sm:$0xff] %vm618_vm1, %v2116_v52 }
  0xf1   : > { %v1042_v27 = vpop.f32.mrf.mxu0 }
  0xf2   : > { %v2407_v28 = vmul.f32 0.35355338, %v1042_v27  ;;  %v1077_v29 = vpop.f32.mrf.mxu1 }
  0xf3   : > { %v2413_v32 = vmul.f32 0.35355338, %v1077_v29 }
  0xf4   : > { %v1170_v30 = vsel %vm1169_vm3, %v2407_v28, -inf }
  0xf5   : > { %1171 = vmax.xlane.f32.xlu1 %v1170_v30  ;;  %v1176_v36 = vsel %vm1169_vm3, %v2413_v32, -inf }
  0xf6   : > { %v1112_v31 = vpop.f32.mrf.mxu2 }
  0xf7   : > { %v2415_v33 = vmul.f32 0.35355338, %v1112_v31  ;;  %v1147_v34 = vpop.f32.mrf.mxu3 }
  0xf8   : > { %v2421_v37 = vmul.f32 0.35355338, %v1147_v34 }
  0xf9   : > { %v1182_v35 = vsel %vm1169_vm3, %v2415_v33, -inf }
  0xfa   : > { %1183 = vmax.xlane.f32.xlu0 %v1182_v35  ;;  %v1080_v39 = vpop.f32.mrf.mxu1  ;;  %v1188_v42 = vsel %vm1169_vm3, %v2421_v37, -inf }
  0xfb   : > { %v2423_v40 = vmul.f32 0.35355338, %v1080_v39  ;;  %v1045_v44 = vpop.f32.mrf.mxu0 }
  0xfc   : > { %v2433_v47 = vmul.f32 0.35355338, %v1045_v44  ;;  %v898_v44 = vld [vmem:[%s2496_s26 + $0x38] sm:$0xf] }
  0xfd   : > { %1177 = vmax.xlane.f32.xlu1 %v1176_v36  ;;  %v1179_v46 = vsel %vm1169_vm3, %v2423_v40, -inf }
  0xfe   : > { %v1173_v49 = vsel %vm1169_vm3, %v2433_v47, -inf }
  0xff   : > { %v1115_v41 = vpop.f32.mrf.mxu2  ;;  %v1150_v45 = vpop.f32.mrf.mxu3 }
 0x100   : > { %v2427_v43 = vmul.f32 0.35355338, %v1115_v41  ;;  %v2435_v48 = vmul.f32 0.35355338, %v1150_v45  ;;  %v968_v45 = vrot.slane %v898_v44, 4 }
 0x102   : > { %1189 = vmax.xlane.f32.xlu0 %v1188_v42  ;;  %v1185_v38 = vsel %vm1169_vm3, %v2427_v43, -inf  ;;  %v1191_v50 = vsel %vm1169_vm3, %v2435_v48, -inf }
 0x103   : > { %1186 = vmax.xlane.f32.xlu2 %v1185_v38  ;;  %v894_v38 = vld [vmem:[%s2496_s26 + $0x28] sm:$0xf] }
 0x105   : > { %1180 = vmax.xlane.f32.xlu1 %v1179_v46  ;;  %v896_v46 = vld [vmem:[%s2496_s26 + $0x30] sm:$0xf] }
 0x106   : > { %v969_v51 = vsel %vm644_vm0, %v968_v45, %v896_v46 }
 0x10a   : > { %1174 = vmax.xlane.f32.xlu0 %v1173_v49  ;;  %v899_v49 = vld [vmem:[%s2496_s26 + $0x3c] sm:$0xf] }
 0x10b   : > { %1192 = vmax.xlane.f32.xlu2 %v1191_v50  ;;  %v956_v50 = vrot.slane %v894_v38, 4  ;;  %v974_v52 = vrot.slane %v899_v49, 4 }
 0x168   : > { %v1172_v54 = vpop.xlane.xlu1 %1171 }
 0x169   : > { %v1194_v55 = vmax.f32 %v1161_v53, %v1172_v54  ;;  %v892_v54 = vld [vmem:[%s2496_s26 + $0x20] sm:$0xf] }
 0x16b   : > { %1535 = vst.msk [vmem:[#allocation2] sm:$0xff] %vm601_vm2, %v1194_v55  ;;  %1228 = vperm.xlu1 %2023, %v1194_v55   ;;  %v1202_v22 = vsub.f32 %v1161_v53, %v1194_v55  ;;  %v890_v53 = vld [vmem:[%s2496_s26 + $0x18] sm:$0xf]  ;;  %v895_v55 = vld [vmem:[%s2496_s26 + $0x2c] sm:$0xf] }
 0x16d   : > { %v1184_v57 = vpop.xlane.xlu0 %1183  ;;  %v1210_v24 = vmul.f32 1.442695, %v1202_v22  ;;  %v889_v22 = vld [vmem:[%s2496_s26 + $0x14] sm:$0xf] }
 0x16e   : > { %v1198_v59 = vmax.f32 %v1165_v56, %v1184_v57  ;;  %v973_v57 = vperm.slane %v969_v51, %v2268_v58 }
 0x170   : > { %1539 = vst.msk [vmem:[#allocation2 + $0x20] sm:$0xff] %vm601_vm2, %v1198_v59  ;;  %1248 = vperm.xlu2 %2021, %v1198_v59   ;;  %v1178_v61 = vpop.xlane.xlu1 %1177  ;;  %v1206_v10 = vsub.f32 %v1165_v56, %v1198_v59  ;;  %v897_v56 = vld [vmem:[%s2496_s26 + $0x34] sm:$0xf]  ;;  %v957_v59 = vsel %vm644_vm0, %v956_v50, %v892_v54 }
 0x171   : > { %v1196_v62 = vmax.f32 %v1163_v60, %v1178_v61  ;;  %v975_v61 = vsel %vm644_vm0, %v974_v52, %v897_v56 }
 0x172   : > { %v1218_v15 = vmul.f32 1.442695, %v1206_v10  ;;  %v891_v10 = vld [vmem:[%s2496_s26 + $0x1c] sm:$0xf] }
 0x173   : > { %v1204_v63 = vsub.f32 %v1163_v60, %v1196_v62  ;;  %1537 = vst.msk [vmem:[#allocation2 + $0x10] sm:$0xff] %vm601_vm2, %v1196_v62  ;;  %v962_v60 = vrot.slane %v895_v55, 4 }
 0x175   : > { %v1214_v3 = vmul.f32 1.442695, %v1204_v63  ;;  %v1190_v4 = vpop.xlane.xlu0 %1189  ;;  %v888_v63 = vld [vmem:[%s2496_s26 + $0x10] sm:$0xf] }
 0x176   : > { %v1200_v5 = vmax.f32 %v1167_v0, %v1190_v4  ;;  %v1187_v6 = vpop.xlane.xlu2 %1186  ;;  %v979_v4 = vperm.slane %v975_v61, %v2268_v58 }
 0x177   : > { %2024 = vpow2.f32 %v1214_v3  ;;  %v1199_v8 = vmax.f32 %v1166_v2, %v1187_v6  ;;  %v961_v3 = vperm.slane %v957_v59, %v2268_v58  ;;  %v884_v6 = vld [vmem:[%s2496_s26] sm:$0xf] }
 0x178   : > { %1541 = vst.msk [vmem:[#allocation2 + $0x30] sm:$0xff] %vm601_vm2, %v1200_v5  ;;  %1238 = vperm.xlu2 %2021, %v1196_v62   ;;  %1258 = vperm.xlu0 %2022, %v1200_v5   ;;  %v1181_v9 = vpop.xlane.xlu1 %1180  ;;  %2026 = vpow2.f32 %v1218_v15  ;;  %v1208_v27 = vsub.f32 %v1167_v0, %v1200_v5  ;;  %v886_v62 = vld [vmem:[%s2496_s26 + $0x8] sm:$0xf]  ;;  %v912_v0 = vrot.slane %v890_v53, 4  ;;  %v994_v5 = vrot.slane %v973_v57, 4 }
 0x179   : > { %1540 = vst.msk [vmem:[#allocation2 + $0x28] sm:$0xff] %vm601_vm2, %v1199_v8  ;;  %v1197_v11 = vmax.f32 %v1164_v7, %v1181_v9  ;;  %v1207_v26 = vsub.f32 %v1166_v2, %v1199_v8  ;;  %v893_v2 = vld [vmem:[%s2496_s26 + $0x24] sm:$0xf]  ;;  %v887_v9 = vld [vmem:[%s2496_s26 + $0xc] sm:$0xf]  ;;  %v982_v15 = vrot.slane %v961_v3, 4 }
 0x17a   : > { %v1222_v31 = vmul.f32 1.442695, %v1208_v27  ;;  %v992_v59 = vrot.slane %v979_v4, 4 }
 0x17b   : > { %1538 = vst.msk [vmem:[#allocation2 + $0x18] sm:$0xff] %vm601_vm2, %v1197_v11  ;;  %v1220_v30 = vmul.f32 1.442695, %v1207_v26  ;;  %v1205_v35 = vsub.f32 %v1164_v7, %v1197_v11  ;;  %v900_v7 = vrot.slane %v886_v62, 4 }
 0x17d   : > { %v2465_v14 = vpop.eup %2024  ;;  %v1175_v16 = vpop.xlane.xlu0 %1174  ;;  %v1216_v36 = vmul.f32 1.442695, %v1205_v35 }
 0x17e   : > { %v1193_v17 = vpop.xlane.xlu2 %1192  ;;  %v1195_v18 = vmax.f32 %v1162_v12, %v1175_v16  ;;  %v2477_v25 = vpop.eup %2026  ;;  %v995_v16 = vsel %vm644_vm0, %v979_v4, %v994_v5 }
 0x17f   : > { %v2468_v19 = vmax.f32 %v2463_v13, %v1193_v17  ;;  %v885_v17 = vld [vmem:[%s2496_s26 + $0x4] sm:$0xf] }
 0x180   : > { %1253 = vperm.xlu2 %2021, %v1199_v8   ;;  %1367 = vperm.xlu0 %2022, %v2465_v14   ;;  %v1203_v20 = vsub.f32 %v1162_v12, %v1195_v18  ;;  %1536 = vst.msk [vmem:[#allocation2 + $0x8] sm:$0xff] %vm601_vm2, %v1195_v18  ;;  %v963_v8 = vsel %vm644_vm0, %v962_v60, %v893_v2 }
 0x181   : > { %v1209_v21 = vsub.f32 %v2463_v13, %v2468_v19  ;;  %1542 = vst.msk [vmem:[#allocation2 + $0x38] sm:$0xff] %vm601_vm2, %v2468_v19  ;;  %1263 = vperm.xlu1 %2023, %v2468_v19   ;;  %v967_v12 = vperm.slane %v963_v8, %v2268_v58  ;;  %v1295_v13 = vld [vmem:[#allocation3 + $0x28] sm:$0xff]  ;;  %v1349_v19 = vld [vmem:[#allocation4 + $0x10] sm:$0xff] }
 0x182   : > { %v1212_v23 = vmul.f32 1.442695, %v1203_v20  ;;  %v1003_v20 = vperm.slane %v995_v16, %v2272_v1 }
 0x183   : > { %v983_v27 = vsel %vm644_vm0, %v967_v12, %v982_v15  ;;  %v980_v52 = vrot.slane %v967_v12, 4 }
 0x184   : > { %2028 = vpow2.f32 %v1212_v23  ;;  %v1008_v35 = vrot.slane %v1003_v20, 4 }
 0x185   : > { %2030 = vpow2.f32 %v1210_v24  ;;  %v906_v24 = vrot.slane %v887_v9, 4  ;;  %v981_v56 = vsel %vm644_vm0, %v980_v52, %v961_v3 }
 0x186   : > { %2032 = vpow2.f32 %v1220_v30  ;;  %v918_v30 = vrot.slane %v891_v10, 4  ;;  %v987_v61 = vperm.slane %v981_v56, %v2272_v1 }
 0x187   : > { %2034 = vpow2.f32 %v1222_v31  ;;  %v991_v31 = vperm.slane %v983_v27, %v2272_v1 }
 0x188   : > { %1377 = vperm.xlu0 %2022, %v2477_v25   ;;  %1233 = vperm.xlu2 %2021, %v1195_v18   ;;  %2036 = vpow2.f32 %v1216_v36  ;;  %v901_v18 = vsel %vm644_vm0, %v900_v7, %v884_v6  ;;  %v907_v36 = vsel %vm644_vm0, %v906_v24, %v885_v17  ;;  %v919_v38 = vsel %vm644_vm0, %v918_v30, %v889_v22 }
 0x189   : > { %1243 = vperm.xlu1 %2023, %v1197_v11   ;;  %v913_v11 = vsel %vm644_vm0, %v912_v0, %v888_v63  ;;  %v905_v23 = vperm.slane %v901_v18, %v2268_v58  ;;  %v911_v45 = vperm.slane %v907_v36, %v2268_v58  ;;  %v1009_v49 = vsel %vm644_vm0, %v1008_v35, %v991_v31 }
 0x18a   : > { %v2480_v29 = vpop.eup %2028  ;;  %v917_v26 = vperm.slane %v913_v11, %v2268_v58  ;;  %v923_v50 = vperm.slane %v919_v38, %v2268_v58  ;;  %1481 = vmatpush.msrb.mxu2 %v1009_v49  ;;  %v993_v63 = vsel %vm644_vm0, %v992_v59, %v973_v57  ;;  %v1006_v6 = vrot.slane %v987_v61, 4 }
 0x18b   : > { %v2482_v34 = vpop.eup %2030  ;;  %v926_v44 = vrot.slane %v905_v23, 4  ;;  %v924_v60 = vrot.slane %v911_v45, 4  ;;  %v999_v5 = vperm.slane %v993_v63, %v2272_v1 }
 0x18c   : > { %v2486_v39 = vpop.eup %2032  ;;  %v938_v46 = vrot.slane %v917_v26, 4  ;;  %v936_v2 = vrot.slane %v923_v50, 4 }
 0x18d   : > { %v2488_v41 = vpop.eup %2034  ;;  %v927_v51 = vsel %vm644_vm0, %v911_v45, %v926_v44  ;;  %v925_v0 = vsel %vm644_vm0, %v924_v60, %v905_v23  ;;  %v1007_v3 = vsel %vm644_vm0, %v999_v5, %v1006_v6  ;;  %v1004_v11 = vrot.slane %v999_v5, 4 }
 0x18e   : > { %v2492_v42 = vpop.eup %2036  ;;  %v935_v53 = vperm.slane %v927_v51, %v2272_v1  ;;  %v939_v54 = vsel %vm644_vm0, %v923_v50, %v938_v46  ;;  %v931_v7 = vperm.slane %v925_v0, %v2272_v1  ;;  %v937_v9 = vsel %vm644_vm0, %v936_v2, %v917_v26  ;;  %1452 = vmatpush.msrb.mxu1 %v1007_v3 }
 0x18f   : > { %v947_v55 = vperm.slane %v939_v54, %v2272_v1  ;;  %v943_v4 = vperm.slane %v937_v9, %v2272_v1  ;;  %v1005_v12 = vsel %vm644_vm0, %v1004_v11, %v987_v61  ;;  %v1010_v23 = vrot.slane %v991_v31, 4 }
 0x190   : > { %1362 = vperm.xlu2 %2021, %v2480_v29   ;;  %v950_v10 = vrot.slane %v931_v7, 4  ;;  %1423 = vmatpush.msrb.mxu0 %v1005_v12  ;;  %v954_v30 = vrot.slane %v935_v53, 4 }
 0x191   : > { %1357 = vperm.xlu1 %2023, %v2482_v34   ;;  %v952_v62 = vrot.slane %v947_v55, 4  ;;  %v948_v15 = vrot.slane %v943_v4, 4  ;;  %v1011_v27 = vsel %vm644_vm0, %v1003_v20, %v1010_v23 }
 0x192   : > { %v951_v57 = vsel %vm644_vm0, %v943_v4, %v950_v10  ;;  %1510 = vmatpush.msrb.mxu3 %v1011_v27  ;;  %v955_v44 = vsel %vm644_vm0, %v947_v55, %v954_v30  ;;  %v1303_v27 = vmul.f32 %v2486_v39, %v1295_v13  ;;  %v1290_v30 = vld [vmem:[#allocation3] sm:$0xff] }
 0x193   : > { %v953_v8 = vsel %vm644_vm0, %v952_v62, %v935_v53  ;;  %1453 = vmatpush.msrb.mxu1 %v951_v57  ;;  %v949_v16 = vsel %vm644_vm0, %v948_v15, %v931_v7  ;;  %v1292_v15 = vld [vmem:[#allocation3 + $0x10] sm:$0xff] }
 0x194   : > { %1482 = vmatpush.msrb.mxu2 %v953_v8  ;;  %1424 = vmatpush.msrb.mxu0 %v949_v16  ;;  %v1300_v16 = vmul.f32 %v2465_v14, %v1292_v15 }
 0x195   : > { %1511 = vmatpush.msrb.mxu3 %v955_v44 }
 0x198   : > { %1382 = vperm.xlu2 %2021, %v2486_v39   ;;  %v1294_v39 = vld [vmem:[#allocation3 + $0x20] sm:$0xff] }
 0x199   : > { %1387 = vperm.xlu1 %2023, %v2488_v41  }
 0x1a1   : > { %1372 = vperm.xlu1 %2023, %v2492_v42  }
 0x1ca   : > { %v1249_v17 = vpop.permute.xlu2 %1248 }
 0x1cb   : > { %v1270_v18 = vsub.f32 %v2415_v33, %v1249_v17 }
 0x1cd   : > { %v1282_v22 = vmul.f32 1.442695, %v1270_v18 }
 0x1cf   : > { %2038 = vpow2.f32 %v1282_v22  ;;  %v1351_v22 = vld [vmem:[#allocation4 + $0x20] sm:$0xff] }
 0x1d2   : > { %v1239_v24 = vpop.permute.xlu2 %1238 }
 0x1d3   : > { %v1268_v26 = vsub.f32 %v2413_v32, %v1239_v24 }
 0x1d5   : > { %v2039_v35 = vpop.eup %2038  ;;  %v1278_v36 = vmul.f32 1.442695, %v1268_v26 }
 0x1d6   : > { %1968 = vmatmul.msk.f32.vlgmr.msrb.gmra.mxu2 %vm1169_vm3, %v2039_v35  ;;  %v1318_v60 = vsel %vm1169_vm3, %v2039_v35, 0.0 }
 0x1d7   : > { %2040 = vpow2.f32 %v1278_v36 }
 0x1da   : > { %v1254_v45 = vpop.permute.xlu2 %1253 }
 0x1db   : > { %v1271_v33 = vsub.f32 %v2427_v43, %v1254_v45 }
 0x1dd   : > { %v2041_v38 = vpop.eup %2040  ;;  %v1284_v31 = vmul.f32 1.442695, %v1271_v33  ;;  %v1229_v46 = vpop.permute.xlu1 %1228 }
 0x1de   : > { %v1266_v32 = vsub.f32 %v2407_v28, %v1229_v46  ;;  %1966 = vmatmul.msk.f32.vlgmr.msrb.gmra.mxu1 %vm1169_vm3, %v2041_v38  ;;  %v1312_v20 = vsel %vm1169_vm3, %v2041_v38, 0.0  ;;  %v1298_v38 = vmul.f32 %v2482_v34, %v1290_v30 }
 0x1df   : > { %2042 = vpow2.f32 %v1284_v31  ;;  %1313 = vadd.xlane.f32.xlu1 %v1312_v20 }
 0x1e0   : > { %v1274_v49 = vmul.f32 1.442695, %v1266_v32 }
 0x1e2   : > { %2044 = vpow2.f32 %v1274_v49  ;;  %v1234_v50 = vpop.permute.xlu2 %1233  ;;  %v1347_v49 = vld [vmem:[#allocation4] sm:$0xff] }
 0x1e3   : > { %v1267_v51 = vsub.f32 %v2433_v47, %v1234_v50 }
 0x1e5   : > { %v2043_v52 = vpop.eup %2042  ;;  %v1276_v53 = vmul.f32 1.442695, %v1267_v51  ;;  %v1302_v51 = vmul.f32 %v2477_v25, %v1294_v39  ;;  %v1348_v25 = vld [vmem:[#allocation4 + $0x8] sm:$0xff] }
 0x1e6   : > { %1969 = vmatmul.msk.f32.gmra.mxu2 %vm1169_vm3, %v2043_v52  ;;  %v1321_v43 = vsel %vm1169_vm3, %v2043_v52, 0.0 }
 0x1e7   : > { %1322 = vadd.xlane.f32.xlu1 %v1321_v43  ;;  %2046 = vpow2.f32 %v1276_v53  ;;  %v1352_v53 = vld [vmem:[#allocation4 + $0x28] sm:$0xff] }
 0x1e8   : > { %v2045_v54 = vpop.eup %2044 }
 0x1e9   : > { %1964 = vmatmul.msk.f32.vlgmr.msrb.gmra.mxu0 %vm1169_vm3, %v2045_v54  ;;  %v1306_v28 = vsel %vm1169_vm3, %v2045_v54, 0.0 }
 0x1ea   : > { %1307 = vadd.xlane.f32.xlu0 %v1306_v28  ;;  %v1259_v55 = vpop.permute.xlu0 %1258 }
 0x1eb   : > { %v1272_v56 = vsub.f32 %v2421_v37, %v1259_v55  ;;  %v1296_v55 = vld [vmem:[#allocation3 + $0x30] sm:$0xff] }
 0x1ed   : > { %v1286_v59 = vmul.f32 1.442695, %v1272_v56  ;;  %v2047_v47 = vpop.eup %2046 }
 0x1ee   : > { %v1309_v8 = vsel %vm1169_vm3, %v2047_v47, 0.0 }
 0x1ef   : > { %2048 = vpow2.f32 %v1286_v59 }
 0x1f1   : > { %1965 = vmatmul.msk.f32.gmra.mxu0 %vm1169_vm3, %v2047_v47 }
 0x1f2   : > { %1319 = vadd.xlane.f32.xlu0 %v1318_v60  ;;  %v1368_v12 = vpop.permute.xlu0 %1367 }
 0x1f3   : > { %v1264_v61 = vpop.permute.xlu1 %1263  ;;  %v1397_v35 = vmul.f32 %v1368_v12, %v1349_v19 }
 0x1f4   : > { %v1273_v62 = vsub.f32 %v2435_v48, %v1264_v61  ;;  %v1304_v61 = vmul.f32 %v2488_v41, %v1296_v55 }
 0x1f5   : > { %v2049_v63 = vpop.eup %2048 }
 0x1f6   : > { %v1288_v0 = vmul.f32 1.442695, %v1273_v62  ;;  %1970 = vmatmul.msk.f32.vlgmr.msrb.gmra.mxu3 %vm1169_vm3, %v2049_v63  ;;  %v1324_v2 = vsel %vm1169_vm3, %v2049_v63, 0.0 }
 0x1f7   : > { %1325 = vadd.xlane.f32.xlu2 %v1324_v2 }
 0x1f8   : > { %2050 = vpow2.f32 %v1288_v0 }
 0x1fa   : > { %v1378_v23 = vpop.permute.xlu0 %1377 }
 0x1fb   : > { %v1244_v37 = vpop.permute.xlu1 %1243  ;;  %v1399_v24 = vmul.f32 %v1378_v23, %v1351_v22 }
 0x1fc   : > { %v1269_v5 = vsub.f32 %v2423_v40, %v1244_v37  ;;  %v1224_v40 = vmul.f32 1.442695, %v1209_v21  ;;  %v1363_v21 = vpop.permute.xlu2 %1362 }
 0x1fd   : > { %v1396_v37 = vmul.f32 %v1363_v21, %v1348_v25 }
 0x1fe   : > { %v2051_v6 = vpop.eup %2050  ;;  %v1280_v7 = vmul.f32 1.442695, %v1269_v5 }
 0x1ff   : > { %1971 = vmatmul.msk.f32.gmra.mxu3 %vm1169_vm3, %v2051_v6  ;;  %v1327_v9 = vsel %vm1169_vm3, %v2051_v6, 0.0  ;;  %1310 = vadd.xlane.f32.xlu2 %v1309_v8 }
 0x200   : > { %2052 = vpow2.f32 %v1280_v7  ;;  %1328 = vadd.xlane.f32.xlu0 %v1327_v9  ;;  %v1291_v7 = vld [vmem:[#allocation3 + $0x8] sm:$0xff]  ;;  %v1297_v9 = vld [vmem:[#allocation3 + $0x38] sm:$0xff] }
 0x201   : > { %2054 = vpow2.f32 %v1224_v40  ;;  %v1299_v41 = vmul.f32 %v2480_v29, %v1291_v7 }
 0x203   : > { %v1358_v10 = vpop.permute.xlu1 %1357 }
 0x204   : > { %v1383_v20 = vpop.permute.xlu2 %1382  ;;  %v1395_v34 = vmul.f32 %v1358_v10, %v1347_v49 }
 0x205   : > { %v1400_v47 = vmul.f32 %v1383_v20, %v1352_v53 }
 0x206   : > { %v2053_v48 = vpop.eup %2052 }
 0x207   : > { %1967 = vmatmul.msk.f32.gmra.mxu1 %vm1169_vm3, %v2053_v48  ;;  %v1315_v3 = vsel %vm1169_vm3, %v2053_v48, 0.0  ;;  %v2581_v4 = vpop.eup %2054 }
 0x208   : > { %1316 = vadd.xlane.f32.xlu2 %v1315_v3  ;;  %v1305_v40 = vmul.f32 %v2581_v4, %v1297_v9 }
 0x20b   : > { %v2584_v57 = vpop.permute.xlu1 %1387 }
 0x213   : > { %v2586_v11 = vpop.permute.xlu1 %1372 }
 0x214   : > { %1392 = vperm.xlu0 %2022, %v2581_v4  }
 0x252   : > { %v1314_v17 = vpop.xlane.xlu1 %1313 }
 0x253   : > { %v1332_v18 = vadd.f32 %v1314_v17, %v1300_v16  ;;  %v1353_v16 = vld [vmem:[#allocation4 + $0x30] sm:$0xff] }
 0x254   : > { %v1401_v22 = vmul.f32 %v2584_v57, %v1353_v16  ;;  %v1354_v57 = vld [vmem:[#allocation4 + $0x38] sm:$0xff] }
 0x255   : > { %1341 = vst.msk [vmem:[#allocation3 + $0x10] sm:$0xff] %vm601_vm2, %v1332_v18  ;;  %v1293_v18 = vld [vmem:[#allocation3 + $0x18] sm:$0xff] }
 0x256   : > { %v1301_v29 = vmul.f32 %v2492_v42, %v1293_v18 }
 0x259   : > { %v1484_v26 = vpop.f32.mrf.mxu2 }
 0x25a   : > { %v1523_v36 = vadd.f32 %v1484_v26, %v1399_v24  ;;  %v1323_v44 = vpop.xlane.xlu1 %1322  ;;  %v1350_v24 = vld [vmem:[#allocation4 + $0x18] sm:$0xff] }
 0x25b   : > { %v1335_v45 = vadd.f32 %v1323_v44, %v1303_v27  ;;  %v1455_v33 = vpop.f32.mrf.mxu1  ;;  %v1398_v30 = vmul.f32 %v2586_v11, %v1350_v24 }
 0x25c   : > { %1531 = vst.msk [vmem:[#allocation4 + $0x20] sm:$0xff] %vm618_vm1, %v1523_v36  ;;  %v1521_v14 = vadd.f32 %v1455_v33, %v1397_v35  ;;  %v1556_v31 = vld [vmem:[#allocation3 + $0x10] sm:$0xff] }
 0x25d   : > { %1344 = vst.msk [vmem:[#allocation3 + $0x28] sm:$0xff] %vm601_vm2, %v1335_v45  ;;  %v1308_v46 = vpop.xlane.xlu0 %1307  ;;  %2056 = vrcp.f32 %v1556_v31 }
 0x25e   : > { %1529 = vst.msk [vmem:[#allocation4 + $0x10] sm:$0xff] %vm618_vm1, %v1521_v14  ;;  %v1330_v32 = vadd.f32 %v1308_v46, %v1298_v38 }
 0x260   : > { %1339 = vst.msk [vmem:[#allocation3] sm:$0xff] %vm601_vm2, %v1330_v32 }
 0x263   : > { %v2057_v50 = vpop.eup %2056 }
 0x264   : > { %1582 = vperm.xlu0 %2022, %v2057_v50   ;;  %v1559_v52 = vld [vmem:[#allocation3 + $0x28] sm:$0xff] }
 0x265   : > { %v1320_v43 = vpop.xlane.xlu0 %1319  ;;  %2058 = vrcp.f32 %v1559_v52 }
 0x266   : > { %v1334_v54 = vadd.f32 %v1320_v43, %v1302_v51  ;;  %v1426_v28 = vpop.f32.mrf.mxu0  ;;  %v1550_v51 = vld [vmem:[#allocation4 + $0x20] sm:$0xff]  ;;  %v1548_v43 = vld [vmem:[#allocation4 + $0x10] sm:$0xff] }
 0x267   : > { %v1519_v56 = vadd.f32 %v1426_v28, %v1395_v34  ;;  %v1554_v59 = vld [vmem:[#allocation3] sm:$0xff] }
 0x268   : > { %1343 = vst.msk [vmem:[#allocation3 + $0x20] sm:$0xff] %vm601_vm2, %v1334_v54  ;;  %2060 = vrcp.f32 %v1554_v59 }
 0x269   : > { %1527 = vst.msk [vmem:[#allocation4] sm:$0xff] %vm618_vm1, %v1519_v56  ;;  %v1487_v60 = vpop.f32.mrf.mxu2 }
 0x26a   : > { %v1524_v62 = vadd.f32 %v1487_v60, %v1400_v47  ;;  %v1326_v63 = vpop.xlane.xlu2 %1325 }
 0x26b   : > { %v2059_v0 = vpop.eup %2058  ;;  %v1336_v2 = vadd.f32 %v1326_v63, %v1304_v61 }
 0x26c   : > { %1532 = vst.msk [vmem:[#allocation4 + $0x28] sm:$0xff] %vm618_vm1, %v1524_v62  ;;  %1597 = vperm.xlu0 %2022, %v2059_v0  }
 0x26d   : > { %1345 = vst.msk [vmem:[#allocation3 + $0x30] sm:$0xff] %vm601_vm2, %v1336_v2 }
 0x26e   : > { %v2061_v5 = vpop.eup %2060  ;;  %v1429_v6 = vpop.f32.mrf.mxu0 }
 0x26f   : > { %v1520_v8 = vadd.f32 %v1429_v6, %v1396_v37  ;;  %1572 = vperm.xlu2 %2021, %v2061_v5   ;;  %v1558_v48 = vld [vmem:[#allocation3 + $0x20] sm:$0xff] }
 0x270   : > { %2062 = vrcp.f32 %v1558_v48  ;;  %v1546_v39 = vld [vmem:[#allocation4] sm:$0xff] }
 0x271   : > { %1528 = vst.msk [vmem:[#allocation4 + $0x8] sm:$0xff] %vm618_vm1, %v1520_v8 }
 0x272   : > { %v1311_v3 = vpop.xlane.xlu2 %1310 }
 0x273   : > { %v1331_v10 = vadd.f32 %v1311_v3, %v1299_v41  ;;  %v1329_v12 = vpop.xlane.xlu0 %1328  ;;  %v1551_v7 = vld [vmem:[#allocation4 + $0x28] sm:$0xff] }
 0x274   : > { %v1337_v15 = vadd.f32 %v1329_v12, %v1305_v40  ;;  %v1560_v31 = vld [vmem:[#allocation3 + $0x30] sm:$0xff] }
 0x275   : > { %1340 = vst.msk [vmem:[#allocation3 + $0x8] sm:$0xff] %vm601_vm2, %v1331_v10 }
 0x276   : > { %v2063_v17 = vpop.eup %2062  ;;  %1346 = vst.msk [vmem:[#allocation3 + $0x38] sm:$0xff] %vm601_vm2, %v1337_v15 }
 0x277   : > { %1592 = vperm.xlu1 %2023, %v2063_v17  }
 0x278   : > { %v1547_v10 = vld [vmem:[#allocation4 + $0x8] sm:$0xff] }
 0x279   : > { %v1513_v23 = vpop.f32.mrf.mxu3 }
 0x27a   : > { %v1525_v13 = vadd.f32 %v1513_v23, %v1401_v22 }
 0x27b   : > { %v1317_v19 = vpop.xlane.xlu2 %1316 }
 0x27c   : > { %1533 = vst.msk [vmem:[#allocation4 + $0x30] sm:$0xff] %vm618_vm1, %v1525_v13  ;;  %v1333_v4 = vadd.f32 %v1317_v19, %v1301_v29  ;;  %v1555_v21 = vld [vmem:[#allocation3 + $0x8] sm:$0xff] }
 0x27d   : > { %2064 = vrcp.f32 %v1555_v21  ;;  %v1561_v26 = vld [vmem:[#allocation3 + $0x38] sm:$0xff] }
 0x27e   : > { %1342 = vst.msk [vmem:[#allocation3 + $0x18] sm:$0xff] %vm601_vm2, %v1333_v4  ;;  %2066 = vrcp.f32 %v1561_v26 }
 0x282   : > { %v1516_v33 = vpop.f32.mrf.mxu3 }
 0x283   : > { %v2065_v27 = vpop.eup %2064  ;;  %v1552_v47 = vld [vmem:[#allocation4 + $0x30] sm:$0xff] }
 0x284   : > { %v1458_v35 = vpop.f32.mrf.mxu1  ;;  %1577 = vperm.xlu1 %2023, %v2065_v27   ;;  %v2067_v38 = vpop.eup %2066 }
 0x285   : > { %v1522_v36 = vadd.f32 %v1458_v35, %v1398_v30  ;;  %v1557_v44 = vld [vmem:[#allocation3 + $0x18] sm:$0xff] }
 0x286   : > { %v1393_v42 = vpop.permute.xlu0 %1392  ;;  %2068 = vrcp.f32 %v1557_v44 }
 0x287   : > { %1530 = vst.msk [vmem:[#allocation4 + $0x18] sm:$0xff] %vm618_vm1, %v1522_v36  ;;  %v1402_v45 = vmul.f32 %v1393_v42, %v1354_v57  ;;  %2070 = vrcp.f32 %v1560_v31 }
 0x289   : > { %v1526_v14 = vadd.f32 %v1516_v33, %v1402_v45 }
 0x28b   : > { %1534 = vst.msk [vmem:[#allocation4 + $0x38] sm:$0xff] %vm618_vm1, %v1526_v14 }
 0x28c   : > { %v2069_v46 = vpop.eup %2068  ;;  %1607 = vperm.xlu1 %2023, %v2067_v38  }
 0x28d   : > { %1587 = vperm.xlu2 %2021, %v2069_v46   ;;  %v2071_v11 = vpop.eup %2070 }
 0x28e   : > { %v1549_v4 = vld [vmem:[#allocation4 + $0x18] sm:$0xff] }
 0x292   : > { %v1553_v31 = vld [vmem:[#allocation4 + $0x38] sm:$0xff] }
 0x295   : > { %1602 = vperm.xlu2 %2021, %v2071_v11  }
 0x2c9   : > { %v1573_v32 = vpop.permute.xlu2 %1572 }
 0x2ca   : > { %v1610_v20 = vmul.f32 %v1573_v32, %v1546_v39 }
 0x2cc   : > { %v1620_v53 = vrot.slane %v1610_v20, 4 }
 0x2d6   : > { %v1583_v50 = vpop.permute.xlu0 %1582 }
 0x2d7   : > { %v1612_v54 = vmul.f32 %v1583_v50, %v1548_v43 }
 0x2d9   : > { %v1632_v61 = vrot.slane %v1612_v54, 4 }
 0x2de   : > { %v1598_v2 = vpop.permute.xlu0 %1597 }
 0x2df   : > { %v1615_v3 = vmul.f32 %v1598_v2, %v1551_v7 }
 0x2e1   : > { %v1674_v27 = vrot.slane %v1615_v3, 4 }
 0x2e7   : > { %v1588_v49 = vpop.permute.xlu2 %1587 }
 0x2e8   : > { %v1613_v30 = vmul.f32 %v1588_v49, %v1549_v4 }
 0x2e9   : > { %v1593_v52 = vpop.permute.xlu1 %1592 }
 0x2ea   : > { %v1614_v34 = vmul.f32 %v1593_v52, %v1550_v51  ;;  %v1688_v46 = vrot.slane %v1613_v30, 4 }
 0x2ec   : > { %v1618_v28 = vrot.slane %v1614_v34, 4  ;;  %v1621_v55 = vsel %vm644_vm0, %v1614_v34, %v1620_v53 }
 0x2ed   : > { %v1629_v59 = vperm.slane %v1621_v55, %v2268_v58 }
 0x2ee   : > { %v1619_v56 = vsel %vm644_vm0, %v1618_v28, %v1610_v20 }
 0x2ef   : > { %v1603_v60 = vpop.permute.xlu2 %1602  ;;  %v1625_v62 = vperm.slane %v1619_v56, %v2268_v58  ;;  %v1656_v37 = vrot.slane %v1629_v59, 4 }
 0x2f0   : > { %v1616_v25 = vmul.f32 %v1603_v60, %v1552_v47 }
 0x2f1   : > { %v1644_v8 = vrot.slane %v1625_v62, 4 }
 0x2f2   : > { %v1630_v63 = vrot.slane %v1616_v25, 4  ;;  %v1633_v0 = vsel %vm644_vm0, %v1616_v25, %v1632_v61 }
 0x2f3   : > { %v1641_v5 = vperm.slane %v1633_v0, %v2268_v58 }
 0x2f4   : > { %v1631_v6 = vsel %vm644_vm0, %v1630_v63, %v1612_v54 }
 0x2f5   : > { %v1637_v9 = vperm.slane %v1631_v6, %v2268_v58  ;;  %v1654_v48 = vrot.slane %v1641_v5, 4  ;;  %v1657_v41 = vsel %vm644_vm0, %v1641_v5, %v1656_v37 }
 0x2f6   : > { %v1665_v40 = vperm.slane %v1657_v41, %v2272_v1  ;;  %v1578_v12 = vpop.permute.xlu1 %1577 }
 0x2f7   : > { %v1642_v15 = vrot.slane %v1637_v9, 4  ;;  %v1645_v16 = vsel %vm644_vm0, %v1637_v9, %v1644_v8  ;;  %v1655_v17 = vsel %vm644_vm0, %v1654_v48, %v1629_v59  ;;  %v1611_v18 = vmul.f32 %v1578_v12, %v1547_v10 }
 0x2f8   : > { %v1653_v22 = vperm.slane %v1645_v16, %v2272_v1  ;;  %v1661_v23 = vperm.slane %v1655_v17, %v2272_v1  ;;  %1737 = vst.msk [vmem:[%s2626_s30 + $0x18] sm:$0xf] %vm1730_vm4, %v1665_v40  ;;  %v1672_v29 = vrot.slane %v1665_v40, 4 }
 0x2f9   : > { %v1643_v13 = vsel %vm644_vm0, %v1642_v15, %v1625_v62  ;;  %v1676_v19 = vrot.slane %v1611_v18, 4  ;;  %v1675_v45 = vsel %vm644_vm0, %v1674_v27, %v1611_v18 }
 0x2fa   : > { %v1649_v21 = vperm.slane %v1643_v13, %v2272_v1  ;;  %v1668_v24 = vrot.slane %v1653_v22, 4  ;;  %v1670_v26 = vrot.slane %v1661_v23, 4  ;;  %1733 = vst.msk [vmem:[%s2626_s30 + $0x8] sm:$0xf] %vm1730_vm4, %v1653_v22  ;;  %v1673_v42 = vsel %vm644_vm0, 0.0, %v1672_v29 }
 0x2fb   : > { %1735 = vst.msk [vmem:[%s2626_s30 + $0x10] sm:$0xf] %vm1730_vm4, %v1661_v23  ;;  %v1677_v35 = vsel %vm644_vm0, %v1615_v3, %v1676_v19  ;;  %v1681_v32 = vperm.slane %v1675_v45, %v2268_v58 }
 0x2fc   : > { %v1666_v57 = vrot.slane %v1649_v21, 4  ;;  %v1669_v36 = vsel %vm644_vm0, 0.0, %v1668_v24  ;;  %v1671_v44 = vsel %vm644_vm0, 0.0, %v1670_v26  ;;  %1731 = vst.msk [vmem:[%s2626_s30] sm:$0xf] %vm1730_vm4, %v1649_v21  ;;  %v1685_v14 = vperm.slane %v1677_v35, %v2268_v58 }
 0x2fd   : > { %1734 = vst.msk [vmem:[%s2626_s30 + $0xc] sm:$0xf] %vm1730_vm4, %v1669_v36  ;;  %v1700_v52 = vrot.slane %v1681_v32, 4 }
 0x2fe   : > { %v1667_v33 = vsel %vm644_vm0, 0.0, %v1666_v57  ;;  %1736 = vst.msk [vmem:[%s2626_s30 + $0x14] sm:$0xf] %vm1730_vm4, %v1671_v44  ;;  %v1608_v38 = vpop.permute.xlu1 %1607  ;;  %v1712_v49 = vrot.slane %v1685_v14, 4 }
 0x2ff   : > { %1732 = vst.msk [vmem:[%s2626_s30 + $0x4] sm:$0xf] %vm1730_vm4, %v1667_v33  ;;  %v1617_v11 = vmul.f32 %v1608_v38, %v1553_v31 }
 0x300   : > { %1738 = vst.msk [vmem:[%s2626_s30 + $0x1c] sm:$0xf] %vm1730_vm4, %v1673_v42 }
 0x301   : > { %v1686_v39 = vrot.slane %v1617_v11, 4  ;;  %v1689_v20 = vsel %vm644_vm0, %v1617_v11, %v1688_v46 }
 0x302   : > { %v1697_v50 = vperm.slane %v1689_v20, %v2268_v58 }
 0x303   : > { %v1687_v51 = vsel %vm644_vm0, %v1686_v39, %v1613_v30 }
 0x304   : > { %v1693_v53 = vperm.slane %v1687_v51, %v2268_v58  ;;  %v1710_v34 = vrot.slane %v1697_v50, 4  ;;  %v1713_v43 = vsel %vm644_vm0, %v1697_v50, %v1712_v49 }
 0x305   : > { %v1721_v54 = vperm.slane %v1713_v43, %v2272_v1 }
 0x306   : > { %v1698_v28 = vrot.slane %v1693_v53, 4  ;;  %v1701_v55 = vsel %vm644_vm0, %v1693_v53, %v1700_v52  ;;  %v1711_v56 = vsel %vm644_vm0, %v1710_v34, %v1685_v14 }
 0x307   : > { %v1709_v59 = vperm.slane %v1701_v55, %v2272_v1  ;;  %v1717_v47 = vperm.slane %v1711_v56, %v2272_v1  ;;  %1745 = vst.msk [vmem:[%s2626_s30 + $0x38] sm:$0xf] %vm1730_vm4, %v1721_v54  ;;  %v1728_v60 = vrot.slane %v1721_v54, 4 }
 0x308   : > { %v1699_v58 = vsel %vm644_vm0, %v1698_v28, %v1681_v32 }
 0x309   : > { %v1705_v61 = vperm.slane %v1699_v58, %v2272_v1  ;;  %v1724_v25 = vrot.slane %v1709_v59, 4  ;;  %v1726_v62 = vrot.slane %v1717_v47, 4  ;;  %1741 = vst.msk [vmem:[%s2626_s30 + $0x28] sm:$0xf] %vm1730_vm4, %v1709_v59  ;;  %v1729_v37 = vsel %vm644_vm0, 0.0, %v1728_v60 }
 0x30a   : > { %1743 = vst.msk [vmem:[%s2626_s30 + $0x30] sm:$0xf] %vm1730_vm4, %v1717_v47 }
 0x30b   : > { %v1722_v63 = vrot.slane %v1705_v61, 4  ;;  %v1725_v0 = vsel %vm644_vm0, 0.0, %v1724_v25  ;;  %v1727_v2 = vsel %vm644_vm0, 0.0, %v1726_v62  ;;  %1739 = vst.msk [vmem:[%s2626_s30 + $0x20] sm:$0xf] %vm1730_vm4, %v1705_v61 }
 0x30c   : > { %1742 = vst.msk [vmem:[%s2626_s30 + $0x2c] sm:$0xf] %vm1730_vm4, %v1725_v0 }
 0x30d   : > { %v1723_v5 = vsel %vm644_vm0, 0.0, %v1722_v63  ;;  %1744 = vst.msk [vmem:[%s2626_s30 + $0x34] sm:$0xf] %vm1730_vm4, %v1727_v2 }
 0x30e   : > { %1740 = vst.msk [vmem:[%s2626_s30 + $0x24] sm:$0xf] %vm1730_vm4, %v1723_v5 }
 0x30f   : > { %1746 = vst.msk [vmem:[%s2626_s30 + $0x3c] sm:$0xf] %vm1730_vm4, %v1729_v37 }
 0x310 PF: > { %s13_s16 = sadd.s32 1, %s2110_s16   ;;  %s2713_s12 = smov %s2098_s13 }
 0x311   : > { %p10_p10 = scmp.ge.s32.totalorder %s13_s16, 4   ;;  %s2714_s13 = smov %s2176_s21 }
 0x312   : > { %s2715_s14 = smov %s2106_s15  ;;  %s2716_s15 = smov %s2718_s17 }
 0x313   :  { %12 = sbr.rel (!%p10_p10) target bundleno = 3 (0x3), region = 214 }

</bundles_post_ra>
